<compile_context>
chip_gen: v7x
topology: tpu7x:2x2x1
jax: 0.10.0
libtpu: 0.0.40
codegen_flags: <defaults>
</compile_context>

<pallas_src>
import functools

import jax
import jax.numpy as jnp
from jax.experimental import pallas as pl
from jax.experimental.pallas import tpu as pltpu


def _round_up(x, m):
    return ((x + m - 1) // m) * m


def _tpu_generation():
    """Best-effort TPU generation from device_kind; None if unknown."""
    try:
        kind = jax.devices()[0].device_kind.lower()
    except Exception:
        return None
    for tag, gen in (("v7", 7), ("7x", 7), ("v6", 6), ("v5", 5), ("v4", 4)):
        if tag in kind:
            return gen
    return None


def _pc_kernel(rep0_ref, xerr_ref,
               wfbe_ref, bfbe_ref, wffs_ref, bffs_ref, wlats_ref, blats_ref,
               rep_ref, rep_last_ref, err_ref,
               *, prediction_steps, n_sub, fold_lateral, learning_rate):
    wfbe = wfbe_ref[...]          # (H, I)  = wfb @ werr          (fused)
    wffs = wffs_ref[...]          # (I, H)  = lr*precision * wff  (folded)
    wlats = wlats_ref[...]        # (H, H)  = lr * wlat if folded else wlat

    tb = rep0_ref.shape[0]
    H = wffs.shape[1]
    I = wfbe.shape[1]
    sb = tb // n_sub

    # Hoist bias broadcasts out of the unrolled loop (JAX does not CSE
    # broadcast_in_dim).  (sb, .) shape so all interleaved sub-tiles share the
    # same broadcast value -> n_sub x fewer live vregs than a (tb, .) tile.
    bfbe = jnp.broadcast_to(bfbe_ref[...], (sb, I))   # = bfb @ werr
    bffs = jnp.broadcast_to(bffs_ref[...], (sb, H))   # = lr * bff
    blats = jnp.broadcast_to(blats_ref[...], (sb, H))  # = lr * blat (if folded)

    def mm(a, w):
        return jnp.dot(a.astype(w.dtype), w, preferred_element_type=jnp.float32)

    # Independent per-sub-tile chains: the three matmuls per step are serially
    # dependent, so interleaving n_sub chains hides MXU result-FIFO latency.
    reps = [rep0_ref[pl.ds(s * sb, sb), :] for s in range(n_sub)]
    xerrs = [xerr_ref[pl.ds(s * sb, sb), :] for s in range(n_sub)]

    lr = jnp.float32(learning_rate)
    for step in range(prediction_steps):
        if step == prediction_steps - 1:
            # module's returned `prediction` = feedback(rep at start of last
            # step); the feedback matmul itself runs in the wrapper.
            for s in range(n_sub):
                rep_last_ref[pl.ds(s * sb, sb), :] = reps[s]

        # error_t = (x - feedback(rep)) @ werr + berr
        #         = x_err - (rep @ (wfb@werr) + bfb@werr)
        errs = [xerrs[s] - (mm(reps[s], wfbe) + bfbe) for s in range(n_sub)]
        for s in range(n_sub):
            # lane-dense (tb, steps*I) slab store; reshape in wrapper is free.
            err_ref[pl.ds(s * sb, sb), pl.ds(step * I, I)] = errs[s]

        # rep += lr * feedforward(error * precision)   (folded into wffs/bffs)
        reps = [reps[s] + (mm(errs[s], wffs) + bffs) for s in range(n_sub)]
        # rep += lr * relu(lateral(rep))               (lr folded into wlats/blats)
        lats = [jnp.maximum(mm(reps[s], wlats) + blats, 0.0) for s in range(n_sub)]
        if fold_lateral:
            reps = [jnp.maximum(reps[s] + lats[s], 0.0) for s in range(n_sub)]
        else:
            reps = [jnp.maximum(reps[s] + lr * lats[s], 0.0) for s in range(n_sub)]

    for s in range(n_sub):
        rep_ref[pl.ds(s * sb, sb), :] = reps[s]


def _vmem_estimate_bytes(tb, I, H, steps, wbytes, weight_bufs=1):
    """Rough VMEM footprint: padded (8,128) tiles, double-buffered batch blocks."""
    def tile(r, c, itemsize):
        return _round_up(max(r, 1), 8) * _round_up(max(c, 1), 128) * itemsize
    weights = (tile(H, I, wbytes) + tile(I, H, wbytes) + tile(H, H, wbytes)
               + tile(1, I, 4) + 2 * tile(1, H, 4))
    io = 2 * (tile(tb, H, 4) + tile(tb, I, 4))                    # rep0, xerr inputs
    io += 2 * (2 * tile(tb, H, 4) + tile(tb, steps * I, 4))       # rep, rep_last, errors
    return weight_bufs * weights + io


def pc_layer_with_error_units(x, params, *, prediction_steps=10,
                              learning_rate=0.1, precision=1.0,
                              compute_dtype=jnp.float32):
    """Returns (representation, prediction, errors) matching return_errors=True."""
    if prediction_steps < 1:
        # torch.stack([]) would raise in the reference module as well.
        raise ValueError("prediction_steps must be >= 1 when returning errors")

    B, I = x.shape
    H = params["wff"].shape[1]
    steps = prediction_steps
    f32 = jnp.float32

    wff, bff = params["wff"], params["bff"]
    wfb, bfb = params["wfb"], params["bfb"]
    wlat, blat = params["wlat"], params["blat"]
    werr, berr = params["werr"], params["berr"]

    # ---- weight-only precompute: fusion + lr/precision folding --------------
    wfbe = jnp.dot(wfb, werr, preferred_element_type=f32)            # (H, I)
    bfbe = jnp.dot(bfb, werr, preferred_element_type=f32)            # (1, I)
    fold_lateral = learning_rate >= 0.0                              # relu(lr*z)=lr*relu(z)
    wffs = (learning_rate * precision) * wff                         # (I, H)
    bffs = learning_rate * bff                                       # (1, H)
    wlats = learning_rate * wlat if fold_lateral else wlat           # (H, H)
    blats = learning_rate * blat if fold_lateral else blat           # (1, H)

    # ---- generation-aware batch tiling --------------------------------------
    gen = _tpu_generation()
    if gen is not None and gen >= 7:
        # 2 TensorCores per chip: aim for >= 2 "parallel" grid steps.
        tb = min(256, max(8, _round_up(pl.cdiv(B, 2), 8)))
        budget = 48 << 20            # v7x VMEM is 64 MiB per TC
    elif gen == 6:
        tb = min(512, _round_up(B, 8))   # fill the 2x256^2 MXU; single TC
        budget = 100 << 20
    else:
        tb = min(256, _round_up(B, 8))   # v5e / unknown: single TC, big tiles
        budget = 100 << 20

    wbytes = jnp.dtype(compute_dtype).itemsize
    while tb > 8 and _vmem_estimate_bytes(tb, I, H, steps, wbytes) > budget:
        tb = max(8, _round_up(tb // 2, 8))

    # Interleave independent sub-tile chains (sub-block rows stay 8-aligned).
    n_sub = 4 if tb % 32 == 0 else (2 if tb % 16 == 0 else 1)

    Bp = _round_up(B, tb)
    xp = x.astype(f32)
    if Bp != B:
        xp = jnp.pad(xp, ((0, Bp - B), (0, 0)))

    # One-shot matmuls in the wrapper (cheap; keeps wff/werr/wfb out of VMEM).
    rep0 = jax.nn.relu(jnp.dot(xp, wff, preferred_element_type=f32) + bff)   # (Bp, H)
    xerr = jnp.dot(xp, werr, preferred_element_type=f32) + berr              # (Bp, I)

    grid = (Bp // tb,)
    vmem_est = _vmem_estimate_bytes(tb, I, H, steps, wbytes)
    vmem_limit = int(min(budget, max(32 << 20, 2 * vmem_est + (4 << 20))))

    flops = 2 * Bp * steps * (2 * H * I + H * H)
    bytes_accessed = (4 * Bp * (H + I)                      # rep0, xerr
                      + wbytes * (2 * H * I + H * H)        # wfbe, wffs, wlats
                      + 4 * (I + 2 * H)                     # biases
                      + 4 * Bp * (2 * H + steps * I))       # rep, rep_last, errors
    cost = pl.CostEstimate(flops=flops, transcendentals=0,
                           bytes_accessed=bytes_accessed)

    kernel = functools.partial(
        _pc_kernel, prediction_steps=steps, n_sub=n_sub,
        fold_lateral=fold_lateral, learning_rate=learning_rate)

    weight_args = (wfbe.astype(compute_dtype), bfbe.astype(f32),
                   wffs.astype(compute_dtype), bffs.astype(f32),
                   wlats.astype(compute_dtype), blats.astype(f32))

    out_shapes = (jax.ShapeDtypeStruct((Bp, H), f32),
                  jax.ShapeDtypeStruct((Bp, H), f32),
                  jax.ShapeDtypeStruct((Bp, steps * I), f32))
    out_specs = (pl.BlockSpec((tb, H), lambda b: (b, 0)),            # representation
                 pl.BlockSpec((tb, H), lambda b: (b, 0)),            # rep at start of last step
                 pl.BlockSpec((tb, steps * I), lambda b: (b, 0)))    # errors (lane-dense slab)

    def _build(single_buffer_weights):
        def _resident(shape):
            # Constant block index -> DMA'd once, stays resident across grid
            # steps; single-buffered to halve resident-weight VMEM.
            if single_buffer_weights:
                return pl.BlockSpec(shape, lambda *_: (0,) * len(shape),
                                    pipeline_mode=pl.Buffered(1))
            return pl.BlockSpec(shape, lambda *_: (0,) * len(shape))

        in_specs = [
            pl.BlockSpec((tb, H), lambda b: (b, 0)),   # rep0
            pl.BlockSpec((tb, I), lambda b: (b, 0)),   # xerr
            _resident((H, I)),                         # wfbe
            _resident((1, I)),                         # bfbe
            _resident((I, H)),                         # wffs
            _resident((1, H)),                         # bffs
            _resident((H, H)),                         # wlats
            _resident((1, H)),                         # blats
        ]
        return pl.pallas_call(
            kernel,
            grid=grid,
            out_shape=out_shapes,
            in_specs=in_specs,
            out_specs=out_specs,
            compiler_params=pltpu.CompilerParams(
                dimension_semantics=("parallel",),
                vmem_limit_bytes=vmem_limit),
            cost_estimate=cost,
        )

    try:
        rep_p, rep_last_p, errs_p = _build(True)(rep0, xerr, *weight_args)
    except Exception:
        # Fallback: some toolchains reject Buffered(1) on inputs; retry with
        # default double-buffered resident blocks (still within vmem_limit).
        rep_p, rep_last_p, errs_p = _build(False)(rep0, xerr, *weight_args)

    rep = rep_p[:B]
    # prediction returned by the module = feedback(rep at start of last step)
    pred = jnp.dot(rep_last_p[:B], wfb, preferred_element_type=f32) + bfb
    # (B, steps*I) -> (B, steps, I) is a free row-major reshape (== stack(dim=1))
    errs = errs_p[:B].reshape(B, steps, I)
    return rep, pred, errs


def _xavier_normal(key, fan_in, fan_out):
    std = (2.0 / (fan_in + fan_out)) ** 0.5
    # stored as (in, out) so the kernel/wrapper can do x @ W
    return std * jax.random.normal(key, (fan_in, fan_out), dtype=jnp.float32)


def init_params(key, input_size, hidden_size):
    ks = jax.random.split(key, 8)
    return {
        "wff":  _xavier_normal(ks[0], input_size, hidden_size),
        "bff":  0.01 * jax.random.normal(ks[1], (1, hidden_size), dtype=jnp.float32),
        "wfb":  _xavier_normal(ks[2], hidden_size, input_size),
        "bfb":  0.01 * jax.random.normal(ks[3], (1, input_size), dtype=jnp.float32),
        "wlat": _xavier_normal(ks[4], hidden_size, hidden_size),
        "blat": 0.01 * jax.random.normal(ks[5], (1, hidden_size), dtype=jnp.float32),
        "werr": _xavier_normal(ks[6], input_size, input_size),
        "berr": 0.01 * jax.random.normal(ks[7], (1, input_size), dtype=jnp.float32),
    }


def _reference(x, p, *, prediction_steps, learning_rate, precision):
    """Pure-JAX reference mirroring the PyTorch forward (un-fused, un-folded)."""
    rep = jax.nn.relu(x @ p["wff"] + p["bff"])
    pred = jnp.zeros_like(x)
    errs = []
    for _ in range(prediction_steps):
        pred = rep @ p["wfb"] + p["bfb"]
        raw = x - pred
        err = raw @ p["werr"] + p["berr"]
        errs.append(err)
        delta = (err * precision) @ p["wff"] + p["bff"]
        rep = rep + learning_rate * delta
        rep = rep + learning_rate * jax.nn.relu(rep @ p["wlat"] + p["blat"])
        rep = jax.nn.relu(rep)
    return rep, pred, jnp.stack(errs, axis=1)


if __name__ == "__main__":
    def _check(batch, input_size, hidden_size, steps, lr, prec, key):
        kx, kp = jax.random.split(key)
        x = jax.random.normal(kx, (batch, input_size), dtype=jnp.float32)
        params = init_params(kp, input_size, hidden_size)
        rep, pred, errs = pc_layer_with_error_units(
            x, params, prediction_steps=steps, learning_rate=lr, precision=prec)
        jax.block_until_ready((rep, pred, errs))
        rep_r, pred_r, errs_r = _reference(
            x, params, prediction_steps=steps, learning_rate=lr, precision=prec)
        assert rep.shape == (batch, hidden_size)
        assert pred.shape == (batch, input_size)
        assert errs.shape == (batch, steps, input_size)
        assert jnp.allclose(rep, rep_r, atol=1e-4, rtol=1e-4)
        assert jnp.allclose(pred, pred_r, atol=1e-4, rtol=1e-4)
        assert jnp.allclose(errs, errs_r, atol=1e-4, rtol=1e-4)

    k1, k2 = jax.random.split(jax.random.PRNGKey(0))
    # module defaults
    _check(batch=8, input_size=16, hidden_size=32, steps=10, lr=0.1, prec=1.0, key=k1)
    # exercises batch padding, sub-tile interleave, non-default lr/precision folding
    _check(batch=44, input_size=16, hidden_size=32, steps=6, lr=0.05, prec=0.7, key=k2)

    print("KERNEL_OK")
</pallas_src>

<mosaic_0001>
module attributes {stable_mosaic.version = 11 : i64} {
  func.func @_pc_kernel(%arg0: i32, %arg1: memref<8x32xf32, #tpu.memory_space<vmem>>, %arg2: memref<8x16xf32, #tpu.memory_space<vmem>>, %arg3: memref<32x16xf32, #tpu.memory_space<vmem>>, %arg4: memref<1x16xf32, #tpu.memory_space<vmem>>, %arg5: memref<16x32xf32, #tpu.memory_space<vmem>>, %arg6: memref<1x32xf32, #tpu.memory_space<vmem>>, %arg7: memref<32x32xf32, #tpu.memory_space<vmem>>, %arg8: memref<1x32xf32, #tpu.memory_space<vmem>>, %arg9: memref<8x32xf32, #tpu.memory_space<vmem>>, %arg10: memref<8x32xf32, #tpu.memory_space<vmem>>, %arg11: memref<8x160xf32, #tpu.memory_space<vmem>>) attributes {dimension_semantics = [#tpu.dimension_semantics<parallel>], iteration_bounds = array<i64: 1>, scalar_prefetch = 0 : i64, scratch_operands = 0 : i64, tpu.core_type = #tpu.core_type<tc>, window_params = [{transform_indices = @transform_0, window_bounds = array<i64: 8, 32>}, {transform_indices = @transform_1, window_bounds = array<i64: 8, 16>}, {pipeline_mode = #tpu.pipeline_mode<synchronous>, transform_indices = @transform_2, window_bounds = array<i64: 32, 16>}, {pipeline_mode = #tpu.pipeline_mode<synchronous>, transform_indices = @transform_3, window_bounds = array<i64: 1, 16>}, {pipeline_mode = #tpu.pipeline_mode<synchronous>, transform_indices = @transform_4, window_bounds = array<i64: 16, 32>}, {pipeline_mode = #tpu.pipeline_mode<synchronous>, transform_indices = @transform_5, window_bounds = array<i64: 1, 32>}, {pipeline_mode = #tpu.pipeline_mode<synchronous>, transform_indices = @transform_6, window_bounds = array<i64: 32, 32>}, {pipeline_mode = #tpu.pipeline_mode<synchronous>, transform_indices = @transform_7, window_bounds = array<i64: 1, 32>}, {transform_indices = @transform_8, window_bounds = array<i64: 8, 32>}, {transform_indices = @transform_9, window_bounds = array<i64: 8, 32>}, {transform_indices = @transform_10, window_bounds = array<i64: 8, 160>}]} {
    %c0 = arith.constant 0 : index
    %c0_0 = arith.constant 0 : index
    %0 = vector.load %arg3[%c0, %c0_0] : memref<32x16xf32, #tpu.memory_space<vmem>>, vector<32x16xf32>
    %c0_1 = arith.constant 0 : index
    %c0_2 = arith.constant 0 : index
    %1 = vector.load %arg5[%c0_1, %c0_2] : memref<16x32xf32, #tpu.memory_space<vmem>>, vector<16x32xf32>
    %c0_3 = arith.constant 0 : index
    %c0_4 = arith.constant 0 : index
    %2 = vector.load %arg7[%c0_3, %c0_4] : memref<32x32xf32, #tpu.memory_space<vmem>>, vector<32x32xf32>
    %c0_5 = arith.constant 0 : index
    %c0_6 = arith.constant 0 : index
    %3 = vector.load %arg4[%c0_5, %c0_6] : memref<1x16xf32, #tpu.memory_space<vmem>>, vector<1x16xf32>
    %4 = vector.shape_cast %3 : vector<1x16xf32> to vector<1x16xf32>
    %5 = vector.broadcast %4 : vector<1x16xf32> to vector<8x16xf32>
    %c0_7 = arith.constant 0 : index
    %c0_8 = arith.constant 0 : index
    %6 = vector.load %arg6[%c0_7, %c0_8] : memref<1x32xf32, #tpu.memory_space<vmem>>, vector<1x32xf32>
    %7 = vector.shape_cast %6 : vector<1x32xf32> to vector<1x32xf32>
    %8 = vector.broadcast %7 : vector<1x32xf32> to vector<8x32xf32>
    %c0_9 = arith.constant 0 : index
    %c0_10 = arith.constant 0 : index
    %9 = vector.load %arg8[%c0_9, %c0_10] : memref<1x32xf32, #tpu.memory_space<vmem>>, vector<1x32xf32>
    %10 = vector.shape_cast %9 : vector<1x32xf32> to vector<1x32xf32>
    %11 = vector.broadcast %10 : vector<1x32xf32> to vector<8x32xf32>
    %c0_11 = arith.constant 0 : index
    %c0_12 = arith.constant 0 : index
    %12 = vector.load %arg1[%c0_11, %c0_12] : memref<8x32xf32, #tpu.memory_space<vmem>>, vector<8x32xf32>
    %c0_13 = arith.constant 0 : index
    %c0_14 = arith.constant 0 : index
    %13 = vector.load %arg2[%c0_13, %c0_14] : memref<8x16xf32, #tpu.memory_space<vmem>>, vector<8x16xf32>
    %cst = arith.constant dense<0.000000e+00> : vector<8x16xf32>
    %14 = tpu.matmul %12, %0, %cst {dimension_numbers = #tpu.dot_dimension_numbers<[1], [0], [0], [1], [0, 0, 1, 1], [], []>} : vector<8x32xf32>, vector<32x16xf32>, vector<8x16xf32> -> vector<8x16xf32>
    %15 = arith.addf %14, %5 : vector<8x16xf32>
    %16 = arith.subf %13, %15 : vector<8x16xf32>
    %c0_15 = arith.constant 0 : index
    %c0_16 = arith.constant 0 : index
    %17 = vector.load %arg11[%c0_15, %c0_16] : memref<8x160xf32, #tpu.memory_space<vmem>>, vector<8x16xf32>
    tpu.vector_store %arg11[%c0_15, %c0_16], %16 {strides = array<i32>} : memref<8x160xf32, #tpu.memory_space<vmem>>, vector<8x16xf32>,
    %cst_17 = arith.constant dense<0.000000e+00> : vector<8x32xf32>
    %18 = tpu.matmul %16, %1, %cst_17 {dimension_numbers = #tpu.dot_dimension_numbers<[1], [0], [0], [1], [0, 0, 1, 1], [], []>} : vector<8x16xf32>, vector<16x32xf32>, vector<8x32xf32> -> vector<8x32xf32>
    %19 = arith.addf %18, %8 : vector<8x32xf32>
    %20 = arith.addf %12, %19 : vector<8x32xf32>
    %cst_18 = arith.constant dense<0.000000e+00> : vector<8x32xf32>
    %21 = tpu.matmul %20, %2, %cst_18 {dimension_numbers = #tpu.dot_dimension_numbers<[1], [0], [0], [1], [0, 0, 1, 1], [], []>} : vector<8x32xf32>, vector<32x32xf32>, vector<8x32xf32> -> vector<8x32xf32>
    %22 = arith.addf %21, %11 : vector<8x32xf32>
    %cst_19 = arith.constant 0.000000e+00 : f32
    %23 = vector.broadcast %cst_19 : f32 to vector<8x32xf32>
    %24 = arith.maximumf %22, %23 : vector<8x32xf32>
    %25 = arith.addf %20, %24 : vector<8x32xf32>
    %cst_20 = arith.constant 0.000000e+00 : f32
    %26 = vector.broadcast %cst_20 : f32 to vector<8x32xf32>
    %27 = arith.maximumf %25, %26 : vector<8x32xf32>
    %cst_21 = arith.constant dense<0.000000e+00> : vector<8x16xf32>
    %28 = tpu.matmul %27, %0, %cst_21 {dimension_numbers = #tpu.dot_dimension_numbers<[1], [0], [0], [1], [0, 0, 1, 1], [], []>} : vector<8x32xf32>, vector<32x16xf32>, vector<8x16xf32> -> vector<8x16xf32>
    %29 = arith.addf %28, %5 : vector<8x16xf32>
    %30 = arith.subf %13, %29 : vector<8x16xf32>
    %c0_22 = arith.constant 0 : index
    %c16 = arith.constant 16 : index
    %31 = vector.load %arg11[%c0_22, %c16] : memref<8x160xf32, #tpu.memory_space<vmem>>, vector<8x16xf32>
    tpu.vector_store %arg11[%c0_22, %c16], %30 {strides = array<i32>} : memref<8x160xf32, #tpu.memory_space<vmem>>, vector<8x16xf32>,
    %cst_23 = arith.constant dense<0.000000e+00> : vector<8x32xf32>
    %32 = tpu.matmul %30, %1, %cst_23 {dimension_numbers = #tpu.dot_dimension_numbers<[1], [0], [0], [1], [0, 0, 1, 1], [], []>} : vector<8x16xf32>, vector<16x32xf32>, vector<8x32xf32> -> vector<8x32xf32>
    %33 = arith.addf %32, %8 : vector<8x32xf32>
    %34 = arith.addf %27, %33 : vector<8x32xf32>
    %cst_24 = arith.constant dense<0.000000e+00> : vector<8x32xf32>
    %35 = tpu.matmul %34, %2, %cst_24 {dimension_numbers = #tpu.dot_dimension_numbers<[1], [0], [0], [1], [0, 0, 1, 1], [], []>} : vector<8x32xf32>, vector<32x32xf32>, vector<8x32xf32> -> vector<8x32xf32>
    %36 = arith.addf %35, %11 : vector<8x32xf32>
    %cst_25 = arith.constant 0.000000e+00 : f32
    %37 = vector.broadcast %cst_25 : f32 to vector<8x32xf32>
    %38 = arith.maximumf %36, %37 : vector<8x32xf32>
    %39 = arith.addf %34, %38 : vector<8x32xf32>
    %cst_26 = arith.constant 0.000000e+00 : f32
    %40 = vector.broadcast %cst_26 : f32 to vector<8x32xf32>
    %41 = arith.maximumf %39, %40 : vector<8x32xf32>
    %cst_27 = arith.constant dense<0.000000e+00> : vector<8x16xf32>
    %42 = tpu.matmul %41, %0, %cst_27 {dimension_numbers = #tpu.dot_dimension_numbers<[1], [0], [0], [1], [0, 0, 1, 1], [], []>} : vector<8x32xf32>, vector<32x16xf32>, vector<8x16xf32> -> vector<8x16xf32>
    %43 = arith.addf %42, %5 : vector<8x16xf32>
    %44 = arith.subf %13, %43 : vector<8x16xf32>
    %c0_28 = arith.constant 0 : index
    %c32 = arith.constant 32 : index
    %45 = vector.load %arg11[%c0_28, %c32] : memref<8x160xf32, #tpu.memory_space<vmem>>, vector<8x16xf32>
    tpu.vector_store %arg11[%c0_28, %c32], %44 {strides = array<i32>} : memref<8x160xf32, #tpu.memory_space<vmem>>, vector<8x16xf32>,
    %cst_29 = arith.constant dense<0.000000e+00> : vector<8x32xf32>
    %46 = tpu.matmul %44, %1, %cst_29 {dimension_numbers = #tpu.dot_dimension_numbers<[1], [0], [0], [1], [0, 0, 1, 1], [], []>} : vector<8x16xf32>, vector<16x32xf32>, vector<8x32xf32> -> vector<8x32xf32>
    %47 = arith.addf %46, %8 : vector<8x32xf32>
    %48 = arith.addf %41, %47 : vector<8x32xf32>
    %cst_30 = arith.constant dense<0.000000e+00> : vector<8x32xf32>
    %49 = tpu.matmul %48, %2, %cst_30 {dimension_numbers = #tpu.dot_dimension_numbers<[1], [0], [0], [1], [0, 0, 1, 1], [], []>} : vector<8x32xf32>, vector<32x32xf32>, vector<8x32xf32> -> vector<8x32xf32>
    %50 = arith.addf %49, %11 : vector<8x32xf32>
    %cst_31 = arith.constant 0.000000e+00 : f32
    %51 = vector.broadcast %cst_31 : f32 to vector<8x32xf32>
    %52 = arith.maximumf %50, %51 : vector<8x32xf32>
    %53 = arith.addf %48, %52 : vector<8x32xf32>
    %cst_32 = arith.constant 0.000000e+00 : f32
    %54 = vector.broadcast %cst_32 : f32 to vector<8x32xf32>
    %55 = arith.maximumf %53, %54 : vector<8x32xf32>
    %cst_33 = arith.constant dense<0.000000e+00> : vector<8x16xf32>
    %56 = tpu.matmul %55, %0, %cst_33 {dimension_numbers = #tpu.dot_dimension_numbers<[1], [0], [0], [1], [0, 0, 1, 1], [], []>} : vector<8x32xf32>, vector<32x16xf32>, vector<8x16xf32> -> vector<8x16xf32>
    %57 = arith.addf %56, %5 : vector<8x16xf32>
    %58 = arith.subf %13, %57 : vector<8x16xf32>
    %c0_34 = arith.constant 0 : index
    %c48 = arith.constant 48 : index
    %59 = vector.load %arg11[%c0_34, %c48] : memref<8x160xf32, #tpu.memory_space<vmem>>, vector<8x16xf32>
    tpu.vector_store %arg11[%c0_34, %c48], %58 {strides = array<i32>} : memref<8x160xf32, #tpu.memory_space<vmem>>, vector<8x16xf32>,
    %cst_35 = arith.constant dense<0.000000e+00> : vector<8x32xf32>
    %60 = tpu.matmul %58, %1, %cst_35 {dimension_numbers = #tpu.dot_dimension_numbers<[1], [0], [0], [1], [0, 0, 1, 1], [], []>} : vector<8x16xf32>, vector<16x32xf32>, vector<8x32xf32> -> vector<8x32xf32>
    %61 = arith.addf %60, %8 : vector<8x32xf32>
    %62 = arith.addf %55, %61 : vector<8x32xf32>
    %cst_36 = arith.constant dense<0.000000e+00> : vector<8x32xf32>
    %63 = tpu.matmul %62, %2, %cst_36 {dimension_numbers = #tpu.dot_dimension_numbers<[1], [0], [0], [1], [0, 0, 1, 1], [], []>} : vector<8x32xf32>, vector<32x32xf32>, vector<8x32xf32> -> vector<8x32xf32>
    %64 = arith.addf %63, %11 : vector<8x32xf32>
    %cst_37 = arith.constant 0.000000e+00 : f32
    %65 = vector.broadcast %cst_37 : f32 to vector<8x32xf32>
    %66 = arith.maximumf %64, %65 : vector<8x32xf32>
    %67 = arith.addf %62, %66 : vector<8x32xf32>
    %cst_38 = arith.constant 0.000000e+00 : f32
    %68 = vector.broadcast %cst_38 : f32 to vector<8x32xf32>
    %69 = arith.maximumf %67, %68 : vector<8x32xf32>
    %cst_39 = arith.constant dense<0.000000e+00> : vector<8x16xf32>
    %70 = tpu.matmul %69, %0, %cst_39 {dimension_numbers = #tpu.dot_dimension_numbers<[1], [0], [0], [1], [0, 0, 1, 1], [], []>} : vector<8x32xf32>, vector<32x16xf32>, vector<8x16xf32> -> vector<8x16xf32>
    %71 = arith.addf %70, %5 : vector<8x16xf32>
    %72 = arith.subf %13, %71 : vector<8x16xf32>
    %c0_40 = arith.constant 0 : index
    %c64 = arith.constant 64 : index
    %73 = vector.load %arg11[%c0_40, %c64] : memref<8x160xf32, #tpu.memory_space<vmem>>, vector<8x16xf32>
    tpu.vector_store %arg11[%c0_40, %c64], %72 {strides = array<i32>} : memref<8x160xf32, #tpu.memory_space<vmem>>, vector<8x16xf32>,
    %cst_41 = arith.constant dense<0.000000e+00> : vector<8x32xf32>
    %74 = tpu.matmul %72, %1, %cst_41 {dimension_numbers = #tpu.dot_dimension_numbers<[1], [0], [0], [1], [0, 0, 1, 1], [], []>} : vector<8x16xf32>, vector<16x32xf32>, vector<8x32xf32> -> vector<8x32xf32>
    %75 = arith.addf %74, %8 : vector<8x32xf32>
    %76 = arith.addf %69, %75 : vector<8x32xf32>
    %cst_42 = arith.constant dense<0.000000e+00> : vector<8x32xf32>
    %77 = tpu.matmul %76, %2, %cst_42 {dimension_numbers = #tpu.dot_dimension_numbers<[1], [0], [0], [1], [0, 0, 1, 1], [], []>} : vector<8x32xf32>, vector<32x32xf32>, vector<8x32xf32> -> vector<8x32xf32>
    %78 = arith.addf %77, %11 : vector<8x32xf32>
    %cst_43 = arith.constant 0.000000e+00 : f32
    %79 = vector.broadcast %cst_43 : f32 to vector<8x32xf32>
    %80 = arith.maximumf %78, %79 : vector<8x32xf32>
    %81 = arith.addf %76, %80 : vector<8x32xf32>
    %cst_44 = arith.constant 0.000000e+00 : f32
    %82 = vector.broadcast %cst_44 : f32 to vector<8x32xf32>
    %83 = arith.maximumf %81, %82 : vector<8x32xf32>
    %cst_45 = arith.constant dense<0.000000e+00> : vector<8x16xf32>
    %84 = tpu.matmul %83, %0, %cst_45 {dimension_numbers = #tpu.dot_dimension_numbers<[1], [0], [0], [1], [0, 0, 1, 1], [], []>} : vector<8x32xf32>, vector<32x16xf32>, vector<8x16xf32> -> vector<8x16xf32>
    %85 = arith.addf %84, %5 : vector<8x16xf32>
    %86 = arith.subf %13, %85 : vector<8x16xf32>
    %c0_46 = arith.constant 0 : index
    %c80 = arith.constant 80 : index
    %87 = vector.load %arg11[%c0_46, %c80] : memref<8x160xf32, #tpu.memory_space<vmem>>, vector<8x16xf32>
    tpu.vector_store %arg11[%c0_46, %c80], %86 {strides = array<i32>} : memref<8x160xf32, #tpu.memory_space<vmem>>, vector<8x16xf32>,
    %cst_47 = arith.constant dense<0.000000e+00> : vector<8x32xf32>
    %88 = tpu.matmul %86, %1, %cst_47 {dimension_numbers = #tpu.dot_dimension_numbers<[1], [0], [0], [1], [0, 0, 1, 1], [], []>} : vector<8x16xf32>, vector<16x32xf32>, vector<8x32xf32> -> vector<8x32xf32>
    %89 = arith.addf %88, %8 : vector<8x32xf32>
    %90 = arith.addf %83, %89 : vector<8x32xf32>
    %cst_48 = arith.constant dense<0.000000e+00> : vector<8x32xf32>
    %91 = tpu.matmul %90, %2, %cst_48 {dimension_numbers = #tpu.dot_dimension_numbers<[1], [0], [0], [1], [0, 0, 1, 1], [], []>} : vector<8x32xf32>, vector<32x32xf32>, vector<8x32xf32> -> vector<8x32xf32>
    %92 = arith.addf %91, %11 : vector<8x32xf32>
    %cst_49 = arith.constant 0.000000e+00 : f32
    %93 = vector.broadcast %cst_49 : f32 to vector<8x32xf32>
    %94 = arith.maximumf %92, %93 : vector<8x32xf32>
    %95 = arith.addf %90, %94 : vector<8x32xf32>
    %cst_50 = arith.constant 0.000000e+00 : f32
    %96 = vector.broadcast %cst_50 : f32 to vector<8x32xf32>
    %97 = arith.maximumf %95, %96 : vector<8x32xf32>
    %cst_51 = arith.constant dense<0.000000e+00> : vector<8x16xf32>
    %98 = tpu.matmul %97, %0, %cst_51 {dimension_numbers = #tpu.dot_dimension_numbers<[1], [0], [0], [1], [0, 0, 1, 1], [], []>} : vector<8x32xf32>, vector<32x16xf32>, vector<8x16xf32> -> vector<8x16xf32>
    %99 = arith.addf %98, %5 : vector<8x16xf32>
    %100 = arith.subf %13, %99 : vector<8x16xf32>
    %c0_52 = arith.constant 0 : index
    %c96 = arith.constant 96 : index
    %101 = vector.load %arg11[%c0_52, %c96] : memref<8x160xf32, #tpu.memory_space<vmem>>, vector<8x16xf32>
    tpu.vector_store %arg11[%c0_52, %c96], %100 {strides = array<i32>} : memref<8x160xf32, #tpu.memory_space<vmem>>, vector<8x16xf32>,
    %cst_53 = arith.constant dense<0.000000e+00> : vector<8x32xf32>
    %102 = tpu.matmul %100, %1, %cst_53 {dimension_numbers = #tpu.dot_dimension_numbers<[1], [0], [0], [1], [0, 0, 1, 1], [], []>} : vector<8x16xf32>, vector<16x32xf32>, vector<8x32xf32> -> vector<8x32xf32>
    %103 = arith.addf %102, %8 : vector<8x32xf32>
    %104 = arith.addf %97, %103 : vector<8x32xf32>
    %cst_54 = arith.constant dense<0.000000e+00> : vector<8x32xf32>
    %105 = tpu.matmul %104, %2, %cst_54 {dimension_numbers = #tpu.dot_dimension_numbers<[1], [0], [0], [1], [0, 0, 1, 1], [], []>} : vector<8x32xf32>, vector<32x32xf32>, vector<8x32xf32> -> vector<8x32xf32>
    %106 = arith.addf %105, %11 : vector<8x32xf32>
    %cst_55 = arith.constant 0.000000e+00 : f32
    %107 = vector.broadcast %cst_55 : f32 to vector<8x32xf32>
    %108 = arith.maximumf %106, %107 : vector<8x32xf32>
    %109 = arith.addf %104, %108 : vector<8x32xf32>
    %cst_56 = arith.constant 0.000000e+00 : f32
    %110 = vector.broadcast %cst_56 : f32 to vector<8x32xf32>
    %111 = arith.maximumf %109, %110 : vector<8x32xf32>
    %cst_57 = arith.constant dense<0.000000e+00> : vector<8x16xf32>
    %112 = tpu.matmul %111, %0, %cst_57 {dimension_numbers = #tpu.dot_dimension_numbers<[1], [0], [0], [1], [0, 0, 1, 1], [], []>} : vector<8x32xf32>, vector<32x16xf32>, vector<8x16xf32> -> vector<8x16xf32>
    %113 = arith.addf %112, %5 : vector<8x16xf32>
    %114 = arith.subf %13, %113 : vector<8x16xf32>
    %c0_58 = arith.constant 0 : index
    %c112 = arith.constant 112 : index
    %115 = vector.load %arg11[%c0_58, %c112] : memref<8x160xf32, #tpu.memory_space<vmem>>, vector<8x16xf32>
    tpu.vector_store %arg11[%c0_58, %c112], %114 {strides = array<i32>} : memref<8x160xf32, #tpu.memory_space<vmem>>, vector<8x16xf32>,
    %cst_59 = arith.constant dense<0.000000e+00> : vector<8x32xf32>
    %116 = tpu.matmul %114, %1, %cst_59 {dimension_numbers = #tpu.dot_dimension_numbers<[1], [0], [0], [1], [0, 0, 1, 1], [], []>} : vector<8x16xf32>, vector<16x32xf32>, vector<8x32xf32> -> vector<8x32xf32>
    %117 = arith.addf %116, %8 : vector<8x32xf32>
    %118 = arith.addf %111, %117 : vector<8x32xf32>
    %cst_60 = arith.constant dense<0.000000e+00> : vector<8x32xf32>
    %119 = tpu.matmul %118, %2, %cst_60 {dimension_numbers = #tpu.dot_dimension_numbers<[1], [0], [0], [1], [0, 0, 1, 1], [], []>} : vector<8x32xf32>, vector<32x32xf32>, vector<8x32xf32> -> vector<8x32xf32>
    %120 = arith.addf %119, %11 : vector<8x32xf32>
    %cst_61 = arith.constant 0.000000e+00 : f32
    %121 = vector.broadcast %cst_61 : f32 to vector<8x32xf32>
    %122 = arith.maximumf %120, %121 : vector<8x32xf32>
    %123 = arith.addf %118, %122 : vector<8x32xf32>
    %cst_62 = arith.constant 0.000000e+00 : f32
    %124 = vector.broadcast %cst_62 : f32 to vector<8x32xf32>
    %125 = arith.maximumf %123, %124 : vector<8x32xf32>
    %cst_63 = arith.constant dense<0.000000e+00> : vector<8x16xf32>
    %126 = tpu.matmul %125, %0, %cst_63 {dimension_numbers = #tpu.dot_dimension_numbers<[1], [0], [0], [1], [0, 0, 1, 1], [], []>} : vector<8x32xf32>, vector<32x16xf32>, vector<8x16xf32> -> vector<8x16xf32>
    %127 = arith.addf %126, %5 : vector<8x16xf32>
    %128 = arith.subf %13, %127 : vector<8x16xf32>
    %c0_64 = arith.constant 0 : index
    %c128 = arith.constant 128 : index
    %129 = vector.load %arg11[%c0_64, %c128] : memref<8x160xf32, #tpu.memory_space<vmem>>, vector<8x16xf32>
    tpu.vector_store %arg11[%c0_64, %c128], %128 {strides = array<i32>} : memref<8x160xf32, #tpu.memory_space<vmem>>, vector<8x16xf32>,
    %cst_65 = arith.constant dense<0.000000e+00> : vector<8x32xf32>
    %130 = tpu.matmul %128, %1, %cst_65 {dimension_numbers = #tpu.dot_dimension_numbers<[1], [0], [0], [1], [0, 0, 1, 1], [], []>} : vector<8x16xf32>, vector<16x32xf32>, vector<8x32xf32> -> vector<8x32xf32>
    %131 = arith.addf %130, %8 : vector<8x32xf32>
    %132 = arith.addf %125, %131 : vector<8x32xf32>
    %cst_66 = arith.constant dense<0.000000e+00> : vector<8x32xf32>
    %133 = tpu.matmul %132, %2, %cst_66 {dimension_numbers = #tpu.dot_dimension_numbers<[1], [0], [0], [1], [0, 0, 1, 1], [], []>} : vector<8x32xf32>, vector<32x32xf32>, vector<8x32xf32> -> vector<8x32xf32>
    %134 = arith.addf %133, %11 : vector<8x32xf32>
    %cst_67 = arith.constant 0.000000e+00 : f32
    %135 = vector.broadcast %cst_67 : f32 to vector<8x32xf32>
    %136 = arith.maximumf %134, %135 : vector<8x32xf32>
    %137 = arith.addf %132, %136 : vector<8x32xf32>
    %cst_68 = arith.constant 0.000000e+00 : f32
    %138 = vector.broadcast %cst_68 : f32 to vector<8x32xf32>
    %139 = arith.maximumf %137, %138 : vector<8x32xf32>
    %c0_69 = arith.constant 0 : index
    %c0_70 = arith.constant 0 : index
    %140 = vector.load %arg10[%c0_69, %c0_70] : memref<8x32xf32, #tpu.memory_space<vmem>>, vector<8x32xf32>
    tpu.vector_store %arg10[%c0_69, %c0_70], %139 {strides = array<i32>} : memref<8x32xf32, #tpu.memory_space<vmem>>, vector<8x32xf32>,
    %cst_71 = arith.constant dense<0.000000e+00> : vector<8x16xf32>
    %141 = tpu.matmul %139, %0, %cst_71 {dimension_numbers = #tpu.dot_dimension_numbers<[1], [0], [0], [1], [0, 0, 1, 1], [], []>} : vector<8x32xf32>, vector<32x16xf32>, vector<8x16xf32> -> vector<8x16xf32>
    %142 = arith.addf %141, %5 : vector<8x16xf32>
    %143 = arith.subf %13, %142 : vector<8x16xf32>
    %c0_72 = arith.constant 0 : index
    %c144 = arith.constant 144 : index
    %144 = vector.load %arg11[%c0_72, %c144] : memref<8x160xf32, #tpu.memory_space<vmem>>, vector<8x16xf32>
    tpu.vector_store %arg11[%c0_72, %c144], %143 {strides = array<i32>} : memref<8x160xf32, #tpu.memory_space<vmem>>, vector<8x16xf32>,
    %cst_73 = arith.constant dense<0.000000e+00> : vector<8x32xf32>
    %145 = tpu.matmul %143, %1, %cst_73 {dimension_numbers = #tpu.dot_dimension_numbers<[1], [0], [0], [1], [0, 0, 1, 1], [], []>} : vector<8x16xf32>, vector<16x32xf32>, vector<8x32xf32> -> vector<8x32xf32>
    %146 = arith.addf %145, %8 : vector<8x32xf32>
    %147 = arith.addf %139, %146 : vector<8x32xf32>
    %cst_74 = arith.constant dense<0.000000e+00> : vector<8x32xf32>
    %148 = tpu.matmul %147, %2, %cst_74 {dimension_numbers = #tpu.dot_dimension_numbers<[1], [0], [0], [1], [0, 0, 1, 1], [], []>} : vector<8x32xf32>, vector<32x32xf32>, vector<8x32xf32> -> vector<8x32xf32>
    %149 = arith.addf %148, %11 : vector<8x32xf32>
    %cst_75 = arith.constant 0.000000e+00 : f32
    %150 = vector.broadcast %cst_75 : f32 to vector<8x32xf32>
    %151 = arith.maximumf %149, %150 : vector<8x32xf32>
    %152 = arith.addf %147, %151 : vector<8x32xf32>
    %cst_76 = arith.constant 0.000000e+00 : f32
    %153 = vector.broadcast %cst_76 : f32 to vector<8x32xf32>
    %154 = arith.maximumf %152, %153 : vector<8x32xf32>
    %c0_77 = arith.constant 0 : index
    %c0_78 = arith.constant 0 : index
    %155 = vector.load %arg9[%c0_77, %c0_78] : memref<8x32xf32, #tpu.memory_space<vmem>>, vector<8x32xf32>
    tpu.vector_store %arg9[%c0_77, %c0_78], %154 {strides = array<i32>} : memref<8x32xf32, #tpu.memory_space<vmem>>, vector<8x32xf32>,
    return
  }
  func.func @transform_0(%arg0: i32) -> (i32, i32) {
    %c0_i32 = arith.constant 0 : i32
    %c0_i32_0 = arith.constant 0 : i32
    return %arg0, %c0_i32 : i32, i32
  }
  func.func @transform_1(%arg0: i32) -> (i32, i32) {
    %c0_i32 = arith.constant 0 : i32
    %c0_i32_0 = arith.constant 0 : i32
    return %arg0, %c0_i32 : i32, i32
  }
  func.func @transform_2(%arg0: i32) -> (i32, i32) {
    %c0_i32 = arith.constant 0 : i32
    %c0_i32_0 = arith.constant 0 : i32
    %c0_i32_1 = arith.constant 0 : i32
    return %c0_i32, %c0_i32_0 : i32, i32
  }
  func.func @transform_3(%arg0: i32) -> (i32, i32) {
    %c0_i32 = arith.constant 0 : i32
    %c0_i32_0 = arith.constant 0 : i32
    %c0_i32_1 = arith.constant 0 : i32
    return %c0_i32, %c0_i32_0 : i32, i32
  }
  func.func @transform_4(%arg0: i32) -> (i32, i32) {
    %c0_i32 = arith.constant 0 : i32
    %c0_i32_0 = arith.constant 0 : i32
    %c0_i32_1 = arith.constant 0 : i32
    return %c0_i32, %c0_i32_0 : i32, i32
  }
  func.func @transform_5(%arg0: i32) -> (i32, i32) {
    %c0_i32 = arith.constant 0 : i32
    %c0_i32_0 = arith.constant 0 : i32
    %c0_i32_1 = arith.constant 0 : i32
    return %c0_i32, %c0_i32_0 : i32, i32
  }
  func.func @transform_6(%arg0: i32) -> (i32, i32) {
    %c0_i32 = arith.constant 0 : i32
    %c0_i32_0 = arith.constant 0 : i32
    %c0_i32_1 = arith.constant 0 : i32
    return %c0_i32, %c0_i32_0 : i32, i32
  }
  func.func @transform_7(%arg0: i32) -> (i32, i32) {
    %c0_i32 = arith.constant 0 : i32
    %c0_i32_0 = arith.constant 0 : i32
    %c0_i32_1 = arith.constant 0 : i32
    return %c0_i32, %c0_i32_0 : i32, i32
  }
  func.func @transform_8(%arg0: i32) -> (i32, i32) {
    %c0_i32 = arith.constant 0 : i32
    %c0_i32_0 = arith.constant 0 : i32
    return %arg0, %c0_i32 : i32, i32
  }
  func.func @transform_9(%arg0: i32) -> (i32, i32) {
    %c0_i32 = arith.constant 0 : i32
    %c0_i32_0 = arith.constant 0 : i32
    return %arg0, %c0_i32 : i32, i32
  }
  func.func @transform_10(%arg0: i32) -> (i32, i32) {
    %c0_i32 = arith.constant 0 : i32
    %c0_i32_0 = arith.constant 0 : i32
    return %arg0, %c0_i32 : i32, i32
  }
}

module attributes {stable_mosaic.version = 11 : i64} {
  func.func @_pc_kernel(%arg0: i32, %arg1: memref<8x32xf32, #tpu.memory_space<vmem>>, %arg2: memref<8x16xf32, #tpu.memory_space<vmem>>, %arg3: memref<32x16xf32, #tpu.memory_space<vmem>>, %arg4: memref<1x16xf32, #tpu.memory_space<vmem>>, %arg5: memref<16x32xf32, #tpu.memory_space<vmem>>, %arg6: memref<1x32xf32, #tpu.memory_space<vmem>>, %arg7: memref<32x32xf32, #tpu.memory_space<vmem>>, %arg8: memref<1x32xf32, #tpu.memory_space<vmem>>, %arg9: memref<8x32xf32, #tpu.memory_space<vmem>>, %arg10: memref<8x32xf32, #tpu.memory_space<vmem>>, %arg11: memref<8x160xf32, #tpu.memory_space<vmem>>) attributes {dimension_semantics = [#tpu.dimension_semantics<parallel>], iteration_bounds = array<i64: 1>, scalar_prefetch = 0 : i64, scratch_operands = 0 : i64, tpu.core_type = #tpu.core_type<tc>, window_params = [{transform_indices = @transform_0, window_bounds = array<i64: 8, 32>}, {transform_indices = @transform_1, window_bounds = array<i64: 8, 16>}, {pipeline_mode = #tpu.pipeline_mode<synchronous>, transform_indices = @transform_2, window_bounds = array<i64: 32, 16>}, {pipeline_mode = #tpu.pipeline_mode<synchronous>, transform_indices = @transform_3, window_bounds = array<i64: 1, 16>}, {pipeline_mode = #tpu.pipeline_mode<synchronous>, transform_indices = @transform_4, window_bounds = array<i64: 16, 32>}, {pipeline_mode = #tpu.pipeline_mode<synchronous>, transform_indices = @transform_5, window_bounds = array<i64: 1, 32>}, {pipeline_mode = #tpu.pipeline_mode<synchronous>, transform_indices = @transform_6, window_bounds = array<i64: 32, 32>}, {pipeline_mode = #tpu.pipeline_mode<synchronous>, transform_indices = @transform_7, window_bounds = array<i64: 1, 32>}, {transform_indices = @transform_8, window_bounds = array<i64: 8, 32>}, {transform_indices = @transform_9, window_bounds = array<i64: 8, 32>}, {transform_indices = @transform_10, window_bounds = array<i64: 8, 160>}]} {
    %c0 = arith.constant 0 : index
    %c0_0 = arith.constant 0 : index
    %0 = vector.load %arg3[%c0, %c0_0] : memref<32x16xf32, #tpu.memory_space<vmem>>, vector<32x16xf32>
    %c0_1 = arith.constant 0 : index
    %c0_2 = arith.constant 0 : index
    %1 = vector.load %arg5[%c0_1, %c0_2] : memref<16x32xf32, #tpu.memory_space<vmem>>, vector<16x32xf32>
    %c0_3 = arith.constant 0 : index
    %c0_4 = arith.constant 0 : index
    %2 = vector.load %arg7[%c0_3, %c0_4] : memref<32x32xf32, #tpu.memory_space<vmem>>, vector<32x32xf32>
    %c0_5 = arith.constant 0 : index
    %c0_6 = arith.constant 0 : index
    %3 = vector.load %arg4[%c0_5, %c0_6] : memref<1x16xf32, #tpu.memory_space<vmem>>, vector<1x16xf32>
    %4 = vector.shape_cast %3 : vector<1x16xf32> to vector<1x16xf32>
    %5 = vector.broadcast %4 : vector<1x16xf32> to vector<8x16xf32>
    %c0_7 = arith.constant 0 : index
    %c0_8 = arith.constant 0 : index
    %6 = vector.load %arg6[%c0_7, %c0_8] : memref<1x32xf32, #tpu.memory_space<vmem>>, vector<1x32xf32>
    %7 = vector.shape_cast %6 : vector<1x32xf32> to vector<1x32xf32>
    %8 = vector.broadcast %7 : vector<1x32xf32> to vector<8x32xf32>
    %c0_9 = arith.constant 0 : index
    %c0_10 = arith.constant 0 : index
    %9 = vector.load %arg8[%c0_9, %c0_10] : memref<1x32xf32, #tpu.memory_space<vmem>>, vector<1x32xf32>
    %10 = vector.shape_cast %9 : vector<1x32xf32> to vector<1x32xf32>
    %11 = vector.broadcast %10 : vector<1x32xf32> to vector<8x32xf32>
    %c0_11 = arith.constant 0 : index
    %c0_12 = arith.constant 0 : index
    %12 = vector.load %arg1[%c0_11, %c0_12] : memref<8x32xf32, #tpu.memory_space<vmem>>, vector<8x32xf32>
    %c0_13 = arith.constant 0 : index
    %c0_14 = arith.constant 0 : index
    %13 = vector.load %arg2[%c0_13, %c0_14] : memref<8x16xf32, #tpu.memory_space<vmem>>, vector<8x16xf32>
    %cst = arith.constant dense<0.000000e+00> : vector<8x16xf32>
    %14 = tpu.matmul %12, %0, %cst {dimension_numbers = #tpu.dot_dimension_numbers<[1], [0], [0], [1], [0, 0, 1, 1], [], []>} : vector<8x32xf32>, vector<32x16xf32>, vector<8x16xf32> -> vector<8x16xf32>
    %15 = arith.addf %14, %5 : vector<8x16xf32>
    %16 = arith.subf %13, %15 : vector<8x16xf32>
    %c0_15 = arith.constant 0 : index
    %c0_16 = arith.constant 0 : index
    %17 = vector.load %arg11[%c0_15, %c0_16] : memref<8x160xf32, #tpu.memory_space<vmem>>, vector<8x16xf32>
    tpu.vector_store %arg11[%c0_15, %c0_16], %16 {strides = array<i32>} : memref<8x160xf32, #tpu.memory_space<vmem>>, vector<8x16xf32>,
    %cst_17 = arith.constant dense<0.000000e+00> : vector<8x32xf32>
    %18 = tpu.matmul %16, %1, %cst_17 {dimension_numbers = #tpu.dot_dimension_numbers<[1], [0], [0], [1], [0, 0, 1, 1], [], []>} : vector<8x16xf32>, vector<16x32xf32>, vector<8x32xf32> -> vector<8x32xf32>
    %19 = arith.addf %18, %8 : vector<8x32xf32>
    %20 = arith.addf %12, %19 : vector<8x32xf32>
    %cst_18 = arith.constant dense<0.000000e+00> : vector<8x32xf32>
    %21 = tpu.matmul %20, %2, %cst_18 {dimension_numbers = #tpu.dot_dimension_numbers<[1], [0], [0], [1], [0, 0, 1, 1], [], []>} : vector<8x32xf32>, vector<32x32xf32>, vector<8x32xf32> -> vector<8x32xf32>
    %22 = arith.addf %21, %11 : vector<8x32xf32>
    %cst_19 = arith.constant 0.000000e+00 : f32
    %23 = vector.broadcast %cst_19 : f32 to vector<8x32xf32>
    %24 = arith.maximumf %22, %23 : vector<8x32xf32>
    %25 = arith.addf %20, %24 : vector<8x32xf32>
    %cst_20 = arith.constant 0.000000e+00 : f32
    %26 = vector.broadcast %cst_20 : f32 to vector<8x32xf32>
    %27 = arith.maximumf %25, %26 : vector<8x32xf32>
    %cst_21 = arith.constant dense<0.000000e+00> : vector<8x16xf32>
    %28 = tpu.matmul %27, %0, %cst_21 {dimension_numbers = #tpu.dot_dimension_numbers<[1], [0], [0], [1], [0, 0, 1, 1], [], []>} : vector<8x32xf32>, vector<32x16xf32>, vector<8x16xf32> -> vector<8x16xf32>
    %29 = arith.addf %28, %5 : vector<8x16xf32>
    %30 = arith.subf %13, %29 : vector<8x16xf32>
    %c0_22 = arith.constant 0 : index
    %c16 = arith.constant 16 : index
    %31 = vector.load %arg11[%c0_22, %c16] : memref<8x160xf32, #tpu.memory_space<vmem>>, vector<8x16xf32>
    tpu.vector_store %arg11[%c0_22, %c16], %30 {strides = array<i32>} : memref<8x160xf32, #tpu.memory_space<vmem>>, vector<8x16xf32>,
    %cst_23 = arith.constant dense<0.000000e+00> : vector<8x32xf32>
    %32 = tpu.matmul %30, %1, %cst_23 {dimension_numbers = #tpu.dot_dimension_numbers<[1], [0], [0], [1], [0, 0, 1, 1], [], []>} : vector<8x16xf32>, vector<16x32xf32>, vector<8x32xf32> -> vector<8x32xf32>
    %33 = arith.addf %32, %8 : vector<8x32xf32>
    %34 = arith.addf %27, %33 : vector<8x32xf32>
    %cst_24 = arith.constant dense<0.000000e+00> : vector<8x32xf32>
    %35 = tpu.matmul %34, %2, %cst_24 {dimension_numbers = #tpu.dot_dimension_numbers<[1], [0], [0], [1], [0, 0, 1, 1], [], []>} : vector<8x32xf32>, vector<32x32xf32>, vector<8x32xf32> -> vector<8x32xf32>
    %36 = arith.addf %35, %11 : vector<8x32xf32>
    %cst_25 = arith.constant 0.000000e+00 : f32
    %37 = vector.broadcast %cst_25 : f32 to vector<8x32xf32>
    %38 = arith.maximumf %36, %37 : vector<8x32xf32>
    %39 = arith.addf %34, %38 : vector<8x32xf32>
    %cst_26 = arith.constant 0.000000e+00 : f32
    %40 = vector.broadcast %cst_26 : f32 to vector<8x32xf32>
    %41 = arith.maximumf %39, %40 : vector<8x32xf32>
    %cst_27 = arith.constant dense<0.000000e+00> : vector<8x16xf32>
    %42 = tpu.matmul %41, %0, %cst_27 {dimension_numbers = #tpu.dot_dimension_numbers<[1], [0], [0], [1], [0, 0, 1, 1], [], []>} : vector<8x32xf32>, vector<32x16xf32>, vector<8x16xf32> -> vector<8x16xf32>
    %43 = arith.addf %42, %5 : vector<8x16xf32>
    %44 = arith.subf %13, %43 : vector<8x16xf32>
    %c0_28 = arith.constant 0 : index
    %c32 = arith.constant 32 : index
    %45 = vector.load %arg11[%c0_28, %c32] : memref<8x160xf32, #tpu.memory_space<vmem>>, vector<8x16xf32>
    tpu.vector_store %arg11[%c0_28, %c32], %44 {strides = array<i32>} : memref<8x160xf32, #tpu.memory_space<vmem>>, vector<8x16xf32>,
    %cst_29 = arith.constant dense<0.000000e+00> : vector<8x32xf32>
    %46 = tpu.matmul %44, %1, %cst_29 {dimension_numbers = #tpu.dot_dimension_numbers<[1], [0], [0], [1], [0, 0, 1, 1], [], []>} : vector<8x16xf32>, vector<16x32xf32>, vector<8x32xf32> -> vector<8x32xf32>
    %47 = arith.addf %46, %8 : vector<8x32xf32>
    %48 = arith.addf %41, %47 : vector<8x32xf32>
    %cst_30 = arith.constant dense<0.000000e+00> : vector<8x32xf32>
    %49 = tpu.matmul %48, %2, %cst_30 {dimension_numbers = #tpu.dot_dimension_numbers<[1], [0], [0], [1], [0, 0, 1, 1], [], []>} : vector<8x32xf32>, vector<32x32xf32>, vector<8x32xf32> -> vector<8x32xf32>
    %50 = arith.addf %49, %11 : vector<8x32xf32>
    %cst_31 = arith.constant 0.000000e+00 : f32
    %51 = vector.broadcast %cst_31 : f32 to vector<8x32xf32>
    %52 = arith.maximumf %50, %51 : vector<8x32xf32>
    %53 = arith.addf %48, %52 : vector<8x32xf32>
    %cst_32 = arith.constant 0.000000e+00 : f32
    %54 = vector.broadcast %cst_32 : f32 to vector<8x32xf32>
    %55 = arith.maximumf %53, %54 : vector<8x32xf32>
    %cst_33 = arith.constant dense<0.000000e+00> : vector<8x16xf32>
    %56 = tpu.matmul %55, %0, %cst_33 {dimension_numbers = #tpu.dot_dimension_numbers<[1], [0], [0], [1], [0, 0, 1, 1], [], []>} : vector<8x32xf32>, vector<32x16xf32>, vector<8x16xf32> -> vector<8x16xf32>
    %57 = arith.addf %56, %5 : vector<8x16xf32>
    %58 = arith.subf %13, %57 : vector<8x16xf32>
    %c0_34 = arith.constant 0 : index
    %c48 = arith.constant 48 : index
    %59 = vector.load %arg11[%c0_34, %c48] : memref<8x160xf32, #tpu.memory_space<vmem>>, vector<8x16xf32>
    tpu.vector_store %arg11[%c0_34, %c48], %58 {strides = array<i32>} : memref<8x160xf32, #tpu.memory_space<vmem>>, vector<8x16xf32>,
    %cst_35 = arith.constant dense<0.000000e+00> : vector<8x32xf32>
    %60 = tpu.matmul %58, %1, %cst_35 {dimension_numbers = #tpu.dot_dimension_numbers<[1], [0], [0], [1], [0, 0, 1, 1], [], []>} : vector<8x16xf32>, vector<16x32xf32>, vector<8x32xf32> -> vector<8x32xf32>
    %61 = arith.addf %60, %8 : vector<8x32xf32>
    %62 = arith.addf %55, %61 : vector<8x32xf32>
    %cst_36 = arith.constant dense<0.000000e+00> : vector<8x32xf32>
    %63 = tpu.matmul %62, %2, %cst_36 {dimension_numbers = #tpu.dot_dimension_numbers<[1], [0], [0], [1], [0, 0, 1, 1], [], []>} : vector<8x32xf32>, vector<32x32xf32>, vector<8x32xf32> -> vector<8x32xf32>
    %64 = arith.addf %63, %11 : vector<8x32xf32>
    %cst_37 = arith.constant 0.000000e+00 : f32
    %65 = vector.broadcast %cst_37 : f32 to vector<8x32xf32>
    %66 = arith.maximumf %64, %65 : vector<8x32xf32>
    %67 = arith.addf %62, %66 : vector<8x32xf32>
    %cst_38 = arith.constant 0.000000e+00 : f32
    %68 = vector.broadcast %cst_38 : f32 to vector<8x32xf32>
    %69 = arith.maximumf %67, %68 : vector<8x32xf32>
    %cst_39 = arith.constant dense<0.000000e+00> : vector<8x16xf32>
    %70 = tpu.matmul %69, %0, %cst_39 {dimension_numbers = #tpu.dot_dimension_numbers<[1], [0], [0], [1], [0, 0, 1, 1], [], []>} : vector<8x32xf32>, vector<32x16xf32>, vector<8x16xf32> -> vector<8x16xf32>
    %71 = arith.addf %70, %5 : vector<8x16xf32>
    %72 = arith.subf %13, %71 : vector<8x16xf32>
    %c0_40 = arith.constant 0 : index
    %c64 = arith.constant 64 : index
    %73 = vector.load %arg11[%c0_40, %c64] : memref<8x160xf32, #tpu.memory_space<vmem>>, vector<8x16xf32>
    tpu.vector_store %arg11[%c0_40, %c64], %72 {strides = array<i32>} : memref<8x160xf32, #tpu.memory_space<vmem>>, vector<8x16xf32>,
    %cst_41 = arith.constant dense<0.000000e+00> : vector<8x32xf32>
    %74 = tpu.matmul %72, %1, %cst_41 {dimension_numbers = #tpu.dot_dimension_numbers<[1], [0], [0], [1], [0, 0, 1, 1], [], []>} : vector<8x16xf32>, vector<16x32xf32>, vector<8x32xf32> -> vector<8x32xf32>
    %75 = arith.addf %74, %8 : vector<8x32xf32>
    %76 = arith.addf %69, %75 : vector<8x32xf32>
    %cst_42 = arith.constant dense<0.000000e+00> : vector<8x32xf32>
    %77 = tpu.matmul %76, %2, %cst_42 {dimension_numbers = #tpu.dot_dimension_numbers<[1], [0], [0], [1], [0, 0, 1, 1], [], []>} : vector<8x32xf32>, vector<32x32xf32>, vector<8x32xf32> -> vector<8x32xf32>
    %78 = arith.addf %77, %11 : vector<8x32xf32>
    %cst_43 = arith.constant 0.000000e+00 : f32
    %79 = vector.broadcast %cst_43 : f32 to vector<8x32xf32>
    %80 = arith.maximumf %78, %79 : vector<8x32xf32>
    %81 = arith.addf %76, %80 : vector<8x32xf32>
    %cst_44 = arith.constant 0.000000e+00 : f32
    %82 = vector.broadcast %cst_44 : f32 to vector<8x32xf32>
    %83 = arith.maximumf %81, %82 : vector<8x32xf32>
    %cst_45 = arith.constant dense<0.000000e+00> : vector<8x16xf32>
    %84 = tpu.matmul %83, %0, %cst_45 {dimension_numbers = #tpu.dot_dimension_numbers<[1], [0], [0], [1], [0, 0, 1, 1], [], []>} : vector<8x32xf32>, vector<32x16xf32>, vector<8x16xf32> -> vector<8x16xf32>
    %85 = arith.addf %84, %5 : vector<8x16xf32>
    %86 = arith.subf %13, %85 : vector<8x16xf32>
    %c0_46 = arith.constant 0 : index
    %c80 = arith.constant 80 : index
    %87 = vector.load %arg11[%c0_46, %c80] : memref<8x160xf32, #tpu.memory_space<vmem>>, vector<8x16xf32>
    tpu.vector_store %arg11[%c0_46, %c80], %86 {strides = array<i32>} : memref<8x160xf32, #tpu.memory_space<vmem>>, vector<8x16xf32>,
    %cst_47 = arith.constant dense<0.000000e+00> : vector<8x32xf32>
    %88 = tpu.matmul %86, %1, %cst_47 {dimension_numbers = #tpu.dot_dimension_numbers<[1], [0], [0], [1], [0, 0, 1, 1], [], []>} : vector<8x16xf32>, vector<16x32xf32>, vector<8x32xf32> -> vector<8x32xf32>
    %89 = arith.addf %88, %8 : vector<8x32xf32>
    %90 = arith.addf %83, %89 : vector<8x32xf32>
    %cst_48 = arith.constant dense<0.000000e+00> : vector<8x32xf32>
    %91 = tpu.matmul %90, %2, %cst_48 {dimension_numbers = #tpu.dot_dimension_numbers<[1], [0], [0], [1], [0, 0, 1, 1], [], []>} : vector<8x32xf32>, vector<32x32xf32>, vector<8x32xf32> -> vector<8x32xf32>
    %92 = arith.addf %91, %11 : vector<8x32xf32>
    %cst_49 = arith.constant 0.000000e+00 : f32
    %93 = vector.broadcast %cst_49 : f32 to vector<8x32xf32>
    %94 = arith.maximumf %92, %93 : vector<8x32xf32>
    %95 = arith.addf %90, %94 : vector<8x32xf32>
    %cst_50 = arith.constant 0.000000e+00 : f32
    %96 = vector.broadcast %cst_50 : f32 to vector<8x32xf32>
    %97 = arith.maximumf %95, %96 : vector<8x32xf32>
    %cst_51 = arith.constant dense<0.000000e+00> : vector<8x16xf32>
    %98 = tpu.matmul %97, %0, %cst_51 {dimension_numbers = #tpu.dot_dimension_numbers<[1], [0], [0], [1], [0, 0, 1, 1], [], []>} : vector<8x32xf32>, vector<32x16xf32>, vector<8x16xf32> -> vector<8x16xf32>
    %99 = arith.addf %98, %5 : vector<8x16xf32>
    %100 = arith.subf %13, %99 : vector<8x16xf32>
    %c0_52 = arith.constant 0 : index
    %c96 = arith.constant 96 : index
    %101 = vector.load %arg11[%c0_52, %c96] : memref<8x160xf32, #tpu.memory_space<vmem>>, vector<8x16xf32>
    tpu.vector_store %arg11[%c0_52, %c96], %100 {strides = array<i32>} : memref<8x160xf32, #tpu.memory_space<vmem>>, vector<8x16xf32>,
    %cst_53 = arith.constant dense<0.000000e+00> : vector<8x32xf32>
    %102 = tpu.matmul %100, %1, %cst_53 {dimension_numbers = #tpu.dot_dimension_numbers<[1], [0], [0], [1], [0, 0, 1, 1], [], []>} : vector<8x16xf32>, vector<16x32xf32>, vector<8x32xf32> -> vector<8x32xf32>
    %103 = arith.addf %102, %8 : vector<8x32xf32>
    %104 = arith.addf %97, %103 : vector<8x32xf32>
    %cst_54 = arith.constant dense<0.000000e+00> : vector<8x32xf32>
    %105 = tpu.matmul %104, %2, %cst_54 {dimension_numbers = #tpu.dot_dimension_numbers<[1], [0], [0], [1], [0, 0, 1, 1], [], []>} : vector<8x32xf32>, vector<32x32xf32>, vector<8x32xf32> -> vector<8x32xf32>
    %106 = arith.addf %105, %11 : vector<8x32xf32>
    %cst_55 = arith.constant 0.000000e+00 : f32
    %107 = vector.broadcast %cst_55 : f32 to vector<8x32xf32>
    %108 = arith.maximumf %106, %107 : vector<8x32xf32>
    %109 = arith.addf %104, %108 : vector<8x32xf32>
    %cst_56 = arith.constant 0.000000e+00 : f32
    %110 = vector.broadcast %cst_56 : f32 to vector<8x32xf32>
    %111 = arith.maximumf %109, %110 : vector<8x32xf32>
    %cst_57 = arith.constant dense<0.000000e+00> : vector<8x16xf32>
    %112 = tpu.matmul %111, %0, %cst_57 {dimension_numbers = #tpu.dot_dimension_numbers<[1], [0], [0], [1], [0, 0, 1, 1], [], []>} : vector<8x32xf32>, vector<32x16xf32>, vector<8x16xf32> -> vector<8x16xf32>
    %113 = arith.addf %112, %5 : vector<8x16xf32>
    %114 = arith.subf %13, %113 : vector<8x16xf32>
    %c0_58 = arith.constant 0 : index
    %c112 = arith.constant 112 : index
    %115 = vector.load %arg11[%c0_58, %c112] : memref<8x160xf32, #tpu.memory_space<vmem>>, vector<8x16xf32>
    tpu.vector_store %arg11[%c0_58, %c112], %114 {strides = array<i32>} : memref<8x160xf32, #tpu.memory_space<vmem>>, vector<8x16xf32>,
    %cst_59 = arith.constant dense<0.000000e+00> : vector<8x32xf32>
    %116 = tpu.matmul %114, %1, %cst_59 {dimension_numbers = #tpu.dot_dimension_numbers<[1], [0], [0], [1], [0, 0, 1, 1], [], []>} : vector<8x16xf32>, vector<16x32xf32>, vector<8x32xf32> -> vector<8x32xf32>
    %117 = arith.addf %116, %8 : vector<8x32xf32>
    %118 = arith.addf %111, %117 : vector<8x32xf32>
    %cst_60 = arith.constant dense<0.000000e+00> : vector<8x32xf32>
    %119 = tpu.matmul %118, %2, %cst_60 {dimension_numbers = #tpu.dot_dimension_numbers<[1], [0], [0], [1], [0, 0, 1, 1], [], []>} : vector<8x32xf32>, vector<32x32xf32>, vector<8x32xf32> -> vector<8x32xf32>
    %120 = arith.addf %119, %11 : vector<8x32xf32>
    %cst_61 = arith.constant 0.000000e+00 : f32
    %121 = vector.broadcast %cst_61 : f32 to vector<8x32xf32>
    %122 = arith.maximumf %120, %121 : vector<8x32xf32>
    %123 = arith.addf %118, %122 : vector<8x32xf32>
    %cst_62 = arith.constant 0.000000e+00 : f32
    %124 = vector.broadcast %cst_62 : f32 to vector<8x32xf32>
    %125 = arith.maximumf %123, %124 : vector<8x32xf32>
    %cst_63 = arith.constant dense<0.000000e+00> : vector<8x16xf32>
    %126 = tpu.matmul %125, %0, %cst_63 {dimension_numbers = #tpu.dot_dimension_numbers<[1], [0], [0], [1], [0, 0, 1, 1], [], []>} : vector<8x32xf32>, vector<32x16xf32>, vector<8x16xf32> -> vector<8x16xf32>
    %127 = arith.addf %126, %5 : vector<8x16xf32>
    %128 = arith.subf %13, %127 : vector<8x16xf32>
    %c0_64 = arith.constant 0 : index
    %c128 = arith.constant 128 : index
    %129 = vector.load %arg11[%c0_64, %c128] : memref<8x160xf32, #tpu.memory_space<vmem>>, vector<8x16xf32>
    tpu.vector_store %arg11[%c0_64, %c128], %128 {strides = array<i32>} : memref<8x160xf32, #tpu.memory_space<vmem>>, vector<8x16xf32>,
    %cst_65 = arith.constant dense<0.000000e+00> : vector<8x32xf32>
    %130 = tpu.matmul %128, %1, %cst_65 {dimension_numbers = #tpu.dot_dimension_numbers<[1], [0], [0], [1], [0, 0, 1, 1], [], []>} : vector<8x16xf32>, vector<16x32xf32>, vector<8x32xf32> -> vector<8x32xf32>
    %131 = arith.addf %130, %8 : vector<8x32xf32>
    %132 = arith.addf %125, %131 : vector<8x32xf32>
    %cst_66 = arith.constant dense<0.000000e+00> : vector<8x32xf32>
    %133 = tpu.matmul %132, %2, %cst_66 {dimension_numbers = #tpu.dot_dimension_numbers<[1], [0], [0], [1], [0, 0, 1, 1], [], []>} : vector<8x32xf32>, vector<32x32xf32>, vector<8x32xf32> -> vector<8x32xf32>
    %134 = arith.addf %133, %11 : vector<8x32xf32>
    %cst_67 = arith.constant 0.000000e+00 : f32
    %135 = vector.broadcast %cst_67 : f32 to vector<8x32xf32>
    %136 = arith.maximumf %134, %135 : vector<8x32xf32>
    %137 = arith.addf %132, %136 : vector<8x32xf32>
    %cst_68 = arith.constant 0.000000e+00 : f32
    %138 = vector.broadcast %cst_68 : f32 to vector<8x32xf32>
    %139 = arith.maximumf %137, %138 : vector<8x32xf32>
    %c0_69 = arith.constant 0 : index
    %c0_70 = arith.constant 0 : index
    %140 = vector.load %arg10[%c0_69, %c0_70] : memref<8x32xf32, #tpu.memory_space<vmem>>, vector<8x32xf32>
    tpu.vector_store %arg10[%c0_69, %c0_70], %139 {strides = array<i32>} : memref<8x32xf32, #tpu.memory_space<vmem>>, vector<8x32xf32>,
    %cst_71 = arith.constant dense<0.000000e+00> : vector<8x16xf32>
    %141 = tpu.matmul %139, %0, %cst_71 {dimension_numbers = #tpu.dot_dimension_numbers<[1], [0], [0], [1], [0, 0, 1, 1], [], []>} : vector<8x32xf32>, vector<32x16xf32>, vector<8x16xf32> -> vector<8x16xf32>
    %142 = arith.addf %141, %5 : vector<8x16xf32>
    %143 = arith.subf %13, %142 : vector<8x16xf32>
    %c0_72 = arith.constant 0 : index
    %c144 = arith.constant 144 : index
    %144 = vector.load %arg11[%c0_72, %c144] : memref<8x160xf32, #tpu.memory_space<vmem>>, vector<8x16xf32>
    tpu.vector_store %arg11[%c0_72, %c144], %143 {strides = array<i32>} : memref<8x160xf32, #tpu.memory_space<vmem>>, vector<8x16xf32>,
    %cst_73 = arith.constant dense<0.000000e+00> : vector<8x32xf32>
    %145 = tpu.matmul %143, %1, %cst_73 {dimension_numbers = #tpu.dot_dimension_numbers<[1], [0], [0], [1], [0, 0, 1, 1], [], []>} : vector<8x16xf32>, vector<16x32xf32>, vector<8x32xf32> -> vector<8x32xf32>
    %146 = arith.addf %145, %8 : vector<8x32xf32>
    %147 = arith.addf %139, %146 : vector<8x32xf32>
    %cst_74 = arith.constant dense<0.000000e+00> : vector<8x32xf32>
    %148 = tpu.matmul %147, %2, %cst_74 {dimension_numbers = #tpu.dot_dimension_numbers<[1], [0], [0], [1], [0, 0, 1, 1], [], []>} : vector<8x32xf32>, vector<32x32xf32>, vector<8x32xf32> -> vector<8x32xf32>
    %149 = arith.addf %148, %11 : vector<8x32xf32>
    %cst_75 = arith.constant 0.000000e+00 : f32
    %150 = vector.broadcast %cst_75 : f32 to vector<8x32xf32>
    %151 = arith.maximumf %149, %150 : vector<8x32xf32>
    %152 = arith.addf %147, %151 : vector<8x32xf32>
    %cst_76 = arith.constant 0.000000e+00 : f32
    %153 = vector.broadcast %cst_76 : f32 to vector<8x32xf32>
    %154 = arith.maximumf %152, %153 : vector<8x32xf32>
    %c0_77 = arith.constant 0 : index
    %c0_78 = arith.constant 0 : index
    %155 = vector.load %arg9[%c0_77, %c0_78] : memref<8x32xf32, #tpu.memory_space<vmem>>, vector<8x32xf32>
    tpu.vector_store %arg9[%c0_77, %c0_78], %154 {strides = array<i32>} : memref<8x32xf32, #tpu.memory_space<vmem>>, vector<8x32xf32>,
    return
  }
  func.func @transform_0(%arg0: i32) -> (i32, i32) {
    %c0_i32 = arith.constant 0 : i32
    %c0_i32_0 = arith.constant 0 : i32
    return %arg0, %c0_i32 : i32, i32
  }
  func.func @transform_1(%arg0: i32) -> (i32, i32) {
    %c0_i32 = arith.constant 0 : i32
    %c0_i32_0 = arith.constant 0 : i32
    return %arg0, %c0_i32 : i32, i32
  }
  func.func @transform_2(%arg0: i32) -> (i32, i32) {
    %c0_i32 = arith.constant 0 : i32
    %c0_i32_0 = arith.constant 0 : i32
    %c0_i32_1 = arith.constant 0 : i32
    return %c0_i32, %c0_i32_0 : i32, i32
  }
  func.func @transform_3(%arg0: i32) -> (i32, i32) {
    %c0_i32 = arith.constant 0 : i32
    %c0_i32_0 = arith.constant 0 : i32
    %c0_i32_1 = arith.constant 0 : i32
    return %c0_i32, %c0_i32_0 : i32, i32
  }
  func.func @transform_4(%arg0: i32) -> (i32, i32) {
    %c0_i32 = arith.constant 0 : i32
    %c0_i32_0 = arith.constant 0 : i32
    %c0_i32_1 = arith.constant 0 : i32
    return %c0_i32, %c0_i32_0 : i32, i32
  }
  func.func @transform_5(%arg0: i32) -> (i32, i32) {
    %c0_i32 = arith.constant 0 : i32
    %c0_i32_0 = arith.constant 0 : i32
    %c0_i32_1 = arith.constant 0 : i32
    return %c0_i32, %c0_i32_0 : i32, i32
  }
  func.func @transform_6(%arg0: i32) -> (i32, i32) {
    %c0_i32 = arith.constant 0 : i32
    %c0_i32_0 = arith.constant 0 : i32
    %c0_i32_1 = arith.constant 0 : i32
    return %c0_i32, %c0_i32_0 : i32, i32
  }
  func.func @transform_7(%arg0: i32) -> (i32, i32) {
    %c0_i32 = arith.constant 0 : i32
    %c0_i32_0 = arith.constant 0 : i32
    %c0_i32_1 = arith.constant 0 : i32
    return %c0_i32, %c0_i32_0 : i32, i32
  }
  func.func @transform_8(%arg0: i32) -> (i32, i32) {
    %c0_i32 = arith.constant 0 : i32
    %c0_i32_0 = arith.constant 0 : i32
    return %arg0, %c0_i32 : i32, i32
  }
  func.func @transform_9(%arg0: i32) -> (i32, i32) {
    %c0_i32 = arith.constant 0 : i32
    %c0_i32_0 = arith.constant 0 : i32
    return %arg0, %c0_i32 : i32, i32
  }
  func.func @transform_10(%arg0: i32) -> (i32, i32) {
    %c0_i32 = arith.constant 0 : i32
    %c0_i32_0 = arith.constant 0 : i32
    return %arg0, %c0_i32 : i32, i32
  }
}

</mosaic_0001>

<bundles_post_ra>
// kernel: tpu_custom_call.1
= control target key start
LH: loop header
LB: loop body
LE: loop exit
PB: predicated region body
PF: predicated region fallthrough
CT: control target
= control target key end

     0   :  { %16 = vsyncpa [#allocation3], 0  ;;  %s3532_s0 = inlined_call_operand.vmem [shape: f32[8,32], index: 0, kind: input, shape index: {}]   ;;  %s3533_s1 = inlined_call_operand.hbm [shape: f32[8,16], index: 1, kind: input, shape index: {}]   ;;  %s3534_s2 = inlined_call_operand.vmem [shape: f32[32,16], index: 2, kind: input, shape index: {}]   ;;  %s3535_s3 = inlined_call_operand.vmem [shape: f32[1,16], index: 3, kind: input, shape index: {}]   ;;  %s3536_s4 = inlined_call_operand.vmem [shape: f32[16,32], index: 4, kind: input, shape index: {}]   ;;  %s3537_s5 = inlined_call_operand.vmem [shape: f32[1,32], index: 5, kind: input, shape index: {}]   ;;  %s3538_s6 = inlined_call_operand.vmem [shape: f32[32,32], index: 6, kind: input, shape index: {}]   ;;  %s3539_s7 = inlined_call_operand.vmem [shape: f32[1,32], index: 7, kind: input, shape index: {}]   ;;  %s3540_s8 = inlined_call_operand.hbm [shape: f32[8,32], index: 8, kind: output, shape index: {0}]   ;;  %s3541_s9 = inlined_call_operand.hbm [shape: f32[8,32], index: 9, kind: output, shape index: {1}]   ;;  %s3542_s10 = inlined_call_operand.hbm [shape: f32[8,160], index: 10, kind: output, shape index: {2}]  }
   0x1   :  { %17 = vsyncpa [#allocation4], 0 }
   0x2   :  { %18 = vsyncpa [#allocation7], 0  ;;  %s3117_s13 = smov [#allocation2]   ;;  %s3023_s17 = scalar_lea.hbm %s3533_s1, 128 }
   0x3   :  { %s27_s14 = sshll.u32 %s3117_s13, 4  ;;  %p3024_p0 = scmp.ne.s32.totalorder %s3533_s1, %s3023_s17  ;;  %s28_s14 = int_to_ptr.vmem [resolvable:$true] %s27_s14 }
   0x4   :  { %p3027_p1 = scmp.lt.u32.totalorder %s3023_s17, %s3533_s1 }
   0x6   :  { %p3029_p2 = pnand %p3027_p1, %p3024_p0 }
   0x8   :  { %3032 = shalt.err (!%p3029_p2)
}
   0x9   :  { %s3033_s22 = scalar_lea.vmem %s28_s14, 128  ;;  %p3038_p4 = scmp.lt.s32.totalorder %s28_s14, %s28_s14 }
   0xa   :  { %p3034_p3 = scmp.ne.s32.totalorder %s28_s14, %s3033_s22  ;;  %p3039_p5 = scmp.lt.s32.totalorder %s3033_s22, %s3033_s22 }
   0xc   :  { %p3040_p6 = por %p3039_p5, %p3038_p4 }
   0xe   :  { %p3041_p7 = pnand %p3040_p6, %p3034_p3 }
  0x10   :  { %3044 = shalt.err (!%p3041_p7)
}
  0x11   :  { %30 = dma.hbm_to_vmem [thread:$0]  %s3533_s1, 128, %s28_s14, [#allocation3]  }
  0x12   :  { %3111 = dma.done.wait [#allocation3], 128  }
  0x13   :  { %3112 = vsyncadd [#allocation3], 4294967168  ;;  %v3118_v0 = vmov 0.0|0.0   ;;  %vm3119_vm0 = vmmov 0   ;;  %v3120_v1 = vmov 0.0   ;;  %v46_v2 = vld [vmem:[%s3534_s2] sm:$0xff] }
  0x14   :  { %2859 = vmatprep.subr.bf16.mxu0 %v3118_v0  ;;  %2577 = vmatprep.mubr.msk.f32.mxu0 %vm3119_vm0, %v3120_v1  ;;  %v47_v3 = vld [vmem:[%s3534_s2 + $0x8] sm:$0xff]  ;;  %v48_v4 = vld [vmem:[%s3534_s2 + $0x10] sm:$0xff]  ;;  %v49_v6 = vld [vmem:[%s3534_s2 + $0x18] sm:$0xff]  ;;  %vm79_vm1 = vcmask 261120   ;;  %vm154_vm2 = vcmask 130048   ;;  %vm384_vm3 = vcmask 261248  }
  0x15   :  { %2865 = vmatprep.subr.bf16.mxu1 %v3118_v0  ;;  %2584 = vmatprep.mubr.msk.f32.mxu1 %vm3119_vm0, %v3120_v1  ;;  %v3213_v5 = vpack.c.bf16 %v47_v3, %v46_v2  ;;  %v3219_v7 = vpack.c.bf16 %v49_v6, %v48_v4  ;;  %v77_v8 = vld [vmem:[%s3532_s0] sm:$0xff]  ;;  %v51_v10 = vld [vmem:[%s3536_s4 + $0x8] sm:$0xff]  ;;  %v54_v21 = vld [vmem:[%s3538_s6 + $0x10] sm:$0xff]  ;;  %vm613_vm4 = vcmask 392448   ;;  %s3123_s1 = smov 48   ;;  %vm842_vm5 = vcmask 523648  }
  0x16   :  { %v50_v9 = vld [vmem:[%s3536_s4] sm:$0xff]  ;;  %v53_v14 = vld [vmem:[%s3538_s6 + $0x8] sm:$0xff]  ;;  %v55_v22 = vld [vmem:[%s3538_s6 + $0x18] sm:$0xff]  ;;  %s3124_s27 = smov 64   ;;  %vm1071_vm6 = vcmask 654848   ;;  %s3125_s28 = smov 80  }
  0x17   :  { %2861 = vmatpush3.bf16.msra.mxu0 %v3213_v5  ;;  %v3240_v11 = vpack.c.bf16 %v51_v10, %v50_v9  ;;  %v3247_v12 = vld [vmem:[%s3535_s3] ss:$0 sm:$0xff]  ;;  %v3273_v23 = vpack.c.bf16 %v55_v22, %v54_v21  ;;  %vm1300_vm7 = vcmask 786048   ;;  %s3126_s29 = smov 96   ;;  %vm1529_vm8 = vcmask 917248   ;;  %s3127_s30 = smov 112  }
  0x18   :  { %2862 = vmatprep.subr.bf16.mxu0 %v3118_v0  ;;  %v52_v13 = vld [vmem:[%s3538_s6] sm:$0xff]  ;;  %vm1758_vm9 = vcmask 1048448   ;;  %s3128_s11 = smov [#allocation6]  }
  0x19   :  { %2867 = vmatpush3.bf16.msra.mxu1 %v3240_v11  ;;  %v3255_v15 = vld [vmem:[#allocation2] sm:$0xff]  ;;  %v3258_v19 = vpack.c.bf16 %v53_v14, %v52_v13  ;;  %s2380_s12 = sshll.u32 %s3128_s11, 4  ;;  %s2381_s12 = int_to_ptr.vmem [resolvable:$true] %s2380_s12 }
  0x1a   :  { %2868 = vmatprep.subr.bf16.mxu1 %v3118_v0  ;;  %v3280_v24 = vld [vmem:[%s3537_s5] ss:$0 sm:$0xff]  ;;  %s3121_s5 = smov 16   ;;  %s3045_s13 = scalar_lea.vmem %s2381_s12, 128 }
  0x1b   :  { %2864 = vmatpush3.bf16.msra.mxu0 %v3219_v7  ;;  %v3291_v29 = vld [vmem:[%s3539_s7] ss:$0 sm:$0xff]  ;;  %s3122_s7 = smov 32   ;;  %p3046_p8 = scmp.ne.s32.totalorder %s2381_s12, %s3045_s13 }
  0x1c   :  { %2874 = vmatprep.subr.bf16.mxu0 %v3118_v0  ;;  %p3050_p9 = scmp.lt.s32.totalorder %s2381_s12, %s2381_s12  ;;  %p3051_p10 = scmp.lt.s32.totalorder %s3045_s13, %s3045_s13 }
  0x1e   :  { %2578 = vmatmul.mubr.msk.f32.vlgmr.msra.gmra.mrb[0].mxu0 %vm79_vm1, %v77_v8  ;;  %p3052_p11 = por %p3051_p10, %p3050_p9 }
  0x1f   :  { %2876 = vmatpush3.bf16.msra.mxu0 %v3213_v5  ;;  %2606 = vmatprep.mubr.msk.f32.mxu0 %vm3119_vm0, %v3120_v1 }
  0x20   :  { %2877 = vmatprep.subr.bf16.mxu0 %v3118_v0  ;;  %p3053_p12 = pnand %p3052_p11, %p3046_p8 }
  0x23   :  { %2879 = vmatpush3.bf16.msra.mxu0 %v3219_v7 }
  0x24   :  { %2883 = vmatprep.subr.bf16.mxu0 %v3118_v0 }
  0xf1   :  { %v149_v16 = vpop.f32.mrb[0].mxu0 }
  0xf2   :  { %v150_v17 = vadd.f32 %v3247_v12, %v149_v16  ;;  %v2579_v18 = vpop.f32.mrb[1].mxu0 }
  0xf4   :  { %v153_v20 = vsub.f32 %v3255_v15, %v150_v17 }
  0xf6   :  { %155 = vst.msk [vmem:[#allocation8] sm:$0xff] %vm154_vm2, %v153_v20  ;;  %2585 = vmatmul.mubr.msk.f32.vlgmr.msra.gmra.mrb[0].mxu1 %vm154_vm2, %v153_v20 }
  0xf7   :  { %2870 = vmatpush3.bf16.msra.mxu1 %v3258_v19  ;;  %2595 = vmatprep.mubr.msk.f32.mxu1 %vm3119_vm0, %v3120_v1 }
  0xf8   :  { %2871 = vmatprep.subr.bf16.mxu1 %v3118_v0 }
  0xfb   :  { %2873 = vmatpush3.bf16.msra.mxu1 %v3273_v23 }
  0xfc   :  { %2880 = vmatprep.subr.bf16.mxu1 %v3118_v0 }
 0x1c9   :  { %v225_v25 = vpop.f32.mrb[0].mxu1 }
 0x1ca   :  { %v226_v26 = vadd.f32 %v3280_v24, %v225_v25  ;;  %v2586_v27 = vpop.f32.mrb[1].mxu1 }
 0x1cc   :  { %v229_v28 = vadd.f32 %v226_v26, %v77_v8 }
 0x1ce   :  { %2596 = vmatmul.mubr.msk.f32.vlgmr.msra.gmra.mrb[2].mxu1 %vm79_vm1, %v229_v28 }
 0x1cf   :  { %2882 = vmatpush3.bf16.msra.mxu1 %v3240_v11  ;;  %2613 = vmatprep.mubr.msk.f32.mxu1 %vm3119_vm0, %v3120_v1 }
 0x1d0   :  { %2889 = vmatprep.subr.bf16.mxu1 %v3118_v0 }
 0x2a1   :  { %v299_v30 = vpop.f32.mrb[2].mxu1 }
 0x2a2   :  { %v300_v31 = vadd.f32 %v3291_v29, %v299_v30  ;;  %v2597_v32 = vpop.f32.mrb[3].mxu1 }
 0x2a4   :  { %v303_v33 = vmax.f32 %v300_v31, 0.0 }
 0x2a6   :  { %v304_v34 = vadd.f32 %v303_v33, %v229_v28 }
 0x2a8   :  { %v305_v35 = vmax.f32 %v304_v34, 0.0 }
 0x2aa   :  { %2607 = vmatmul.mubr.msk.f32.vlgmr.msra.gmra.mrb[2].mxu0 %vm79_vm1, %v305_v35 }
 0x2ab   :  { %2885 = vmatpush3.bf16.msra.mxu0 %v3258_v19  ;;  %2624 = vmatprep.mubr.msk.f32.mxu0 %vm3119_vm0, %v3120_v1 }
 0x2ac   :  { %2886 = vmatprep.subr.bf16.mxu0 %v3118_v0 }
 0x2af   :  { %2888 = vmatpush3.bf16.msra.mxu0 %v3273_v23 }
 0x2b0   :  { %2904 = vmatprep.subr.bf16.mxu0 %v3118_v0 }
 0x37d   :  { %v375_v36 = vpop.f32.mrb[2].mxu0 }
 0x37e   :  { %v376_v37 = vadd.f32 %v3247_v12, %v375_v36  ;;  %v2608_v38 = vpop.f32.mrb[3].mxu0 }
 0x380   :  { %v379_v39 = vsub.f32 %v3255_v15, %v376_v37 }
 0x382   :  { %381 = vrot.lane.b32.xlu0 %v379_v39, %s3121_s5  ;;  %2614 = vmatmul.mubr.msk.f32.vlgmr.msra.gmra.mrb[4].mxu1 %vm154_vm2, %v379_v39 }
 0x383   :  { %2891 = vmatpush3.bf16.msra.mxu1 %v3213_v5  ;;  %2635 = vmatprep.mubr.msk.f32.mxu1 %vm3119_vm0, %v3120_v1 }
 0x384   :  { %2892 = vmatprep.subr.bf16.mxu1 %v3118_v0 }
 0x387   :  { %2894 = vmatpush3.bf16.msra.mxu1 %v3219_v7 }
 0x388   :  { %2895 = vmatprep.subr.bf16.mxu1 %v3118_v0 }
 0x3f4   :  { %v382_v40 = vpop.permute.xlu0 %381 }
 0x3f5   :  { %385 = vst.msk [vmem:[#allocation8] sm:$0xff] %vm384_vm3, %v382_v40 }
 0x455   :  { %v454_v41 = vpop.f32.mrb[4].mxu1 }
 0x456   :  { %v455_v42 = vadd.f32 %v3280_v24, %v454_v41  ;;  %v2615_v43 = vpop.f32.mrb[5].mxu1 }
 0x458   :  { %v458_v44 = vadd.f32 %v455_v42, %v305_v35 }
 0x45a   :  { %2625 = vmatmul.mubr.msk.f32.vlgmr.msra.gmra.mrb[4].mxu0 %vm79_vm1, %v458_v44 }
 0x45b   :  { %2906 = vmatpush3.bf16.msra.mxu0 %v3213_v5  ;;  %2664 = vmatprep.mubr.msk.f32.mxu0 %vm3119_vm0, %v3120_v1 }
 0x45c   :  { %2907 = vmatprep.subr.bf16.mxu0 %v3118_v0 }
 0x45f   :  { %2909 = vmatpush3.bf16.msra.mxu0 %v3219_v7 }
 0x460   :  { %2913 = vmatprep.subr.bf16.mxu0 %v3118_v0 }
 0x52d   :  { %v528_v45 = vpop.f32.mrb[4].mxu0 }
 0x52e   :  { %v529_v46 = vadd.f32 %v3291_v29, %v528_v45  ;;  %v2626_v47 = vpop.f32.mrb[5].mxu0 }
 0x530   :  { %v532_v48 = vmax.f32 %v529_v46, 0.0 }
 0x532   :  { %v533_v49 = vadd.f32 %v532_v48, %v458_v44 }
 0x534   :  { %v534_v50 = vmax.f32 %v533_v49, 0.0 }
 0x536   :  { %2636 = vmatmul.mubr.msk.f32.vlgmr.msra.gmra.mrb[6].mxu1 %vm79_vm1, %v534_v50 }
 0x537   :  { %2897 = vmatpush3.bf16.msra.mxu1 %v3240_v11  ;;  %2642 = vmatprep.mubr.msk.f32.mxu1 %vm3119_vm0, %v3120_v1 }
 0x538   :  { %2898 = vmatprep.subr.bf16.mxu1 %v3118_v0 }
 0x609   :  { %v604_v51 = vpop.f32.mrb[6].mxu1 }
 0x60a   :  { %v605_v52 = vadd.f32 %v3247_v12, %v604_v51  ;;  %v2637_v53 = vpop.f32.mrb[7].mxu1 }
 0x60c   :  { %v608_v54 = vsub.f32 %v3255_v15, %v605_v52 }
 0x60e   :  { %610 = vrot.lane.b32.xlu0 %v608_v54, %s3122_s7  ;;  %2643 = vmatmul.mubr.msk.f32.vlgmr.msra.gmra.mrb[8].mxu1 %vm154_vm2, %v608_v54 }
 0x60f   :  { %2900 = vmatpush3.bf16.msra.mxu1 %v3258_v19  ;;  %2653 = vmatprep.mubr.msk.f32.mxu1 %vm3119_vm0, %v3120_v1 }
 0x610   :  { %2901 = vmatprep.subr.bf16.mxu1 %v3118_v0 }
 0x613   :  { %2903 = vmatpush3.bf16.msra.mxu1 %v3273_v23 }
 0x614   :  { %2910 = vmatprep.subr.bf16.mxu1 %v3118_v0 }
 0x680   :  { %v611_v55 = vpop.permute.xlu0 %610 }
 0x681   :  { %614 = vst.msk [vmem:[#allocation8] sm:$0xff] %vm613_vm4, %v611_v55 }
 0x6e1   :  { %v683_v56 = vpop.f32.mrb[8].mxu1 }
 0x6e2   :  { %v684_v57 = vadd.f32 %v3280_v24, %v683_v56  ;;  %v2644_v58 = vpop.f32.mrb[9].mxu1 }
 0x6e4   :  { %v687_v59 = vadd.f32 %v684_v57, %v534_v50 }
 0x6e6   :  { %2654 = vmatmul.mubr.msk.f32.vlgmr.msra.gmra.mrb[10].mxu1 %vm79_vm1, %v687_v59 }
 0x6e7   :  { %2912 = vmatpush3.bf16.msra.mxu1 %v3240_v11  ;;  %2671 = vmatprep.mubr.msk.f32.mxu1 %vm3119_vm0, %v3120_v1 }
 0x6e8   :  { %2919 = vmatprep.subr.bf16.mxu1 %v3118_v0 }
 0x7b9   :  { %v757_v60 = vpop.f32.mrb[10].mxu1 }
 0x7ba   :  { %v758_v61 = vadd.f32 %v3291_v29, %v757_v60  ;;  %v2655_v62 = vpop.f32.mrb[11].mxu1 }
 0x7bc   :  { %v761_v63 = vmax.f32 %v758_v61, 0.0 }
 0x7be   :  { %v762_v2 = vadd.f32 %v761_v63, %v687_v59 }
 0x7c0   :  { %v763_v3 = vmax.f32 %v762_v2, 0.0 }
 0x7c2   :  { %2665 = vmatmul.mubr.msk.f32.vlgmr.msra.gmra.mrb[6].mxu0 %vm79_vm1, %v763_v3 }
 0x7c3   :  { %2915 = vmatpush3.bf16.msra.mxu0 %v3258_v19  ;;  %2682 = vmatprep.mubr.msk.f32.mxu0 %vm3119_vm0, %v3120_v1 }
 0x7c4   :  { %2916 = vmatprep.subr.bf16.mxu0 %v3118_v0 }
 0x7c7   :  { %2918 = vmatpush3.bf16.msra.mxu0 %v3273_v23 }
 0x7c8   :  { %2925 = vmatprep.subr.bf16.mxu0 %v3118_v0 }
 0x895   :  { %v833_v4 = vpop.f32.mrb[6].mxu0 }
 0x896   :  { %v834_v6 = vadd.f32 %v3247_v12, %v833_v4  ;;  %v2666_v8 = vpop.f32.mrb[7].mxu0 }
 0x898   :  { %v837_v9 = vsub.f32 %v3255_v15, %v834_v6 }
 0x89a   :  { %839 = vrot.lane.b32.xlu1 %v837_v9, %s3123_s1  ;;  %2672 = vmatmul.mubr.msk.f32.vlgmr.msra.gmra.mrb[12].mxu1 %vm154_vm2, %v837_v9 }
 0x89b   :  { %2921 = vmatpush3.bf16.msra.mxu1 %v3213_v5  ;;  %2693 = vmatprep.mubr.msk.f32.mxu1 %vm3119_vm0, %v3120_v1 }
 0x89c   :  { %2922 = vmatprep.subr.bf16.mxu1 %v3118_v0 }
 0x89f   :  { %2924 = vmatpush3.bf16.msra.mxu1 %v3219_v7 }
 0x8a0   :  { %2928 = vmatprep.subr.bf16.mxu1 %v3118_v0 }
 0x90c   :  { %v840_v10 = vpop.permute.xlu1 %839 }
 0x90d   :  { %843 = vst.msk [vmem:[#allocation8] sm:$0xff] %vm842_vm5, %v840_v10 }
 0x96d   :  { %v912_v13 = vpop.f32.mrb[12].mxu1 }
 0x96e   :  { %v913_v14 = vadd.f32 %v3280_v24, %v912_v13  ;;  %v2673_v16 = vpop.f32.mrb[13].mxu1 }
 0x970   :  { %v916_v17 = vadd.f32 %v913_v14, %v763_v3 }
 0x972   :  { %2683 = vmatmul.mubr.msk.f32.vlgmr.msra.gmra.mrb[8].mxu0 %vm79_vm1, %v916_v17 }
 0x973   :  { %2927 = vmatpush3.bf16.msra.mxu0 %v3240_v11  ;;  %2700 = vmatprep.mubr.msk.f32.mxu0 %vm3119_vm0, %v3120_v1 }
 0x974   :  { %2934 = vmatprep.subr.bf16.mxu0 %v3118_v0 }
 0xa45   :  { %v986_v18 = vpop.f32.mrb[8].mxu0 }
 0xa46   :  { %v987_v20 = vadd.f32 %v3291_v29, %v986_v18  ;;  %v2684_v21 = vpop.f32.mrb[9].mxu0 }
 0xa48   :  { %v990_v22 = vmax.f32 %v987_v20, 0.0 }
 0xa4a   :  { %v991_v25 = vadd.f32 %v990_v22, %v916_v17 }
 0xa4c   :  { %v992_v26 = vmax.f32 %v991_v25, 0.0 }
 0xa4e   :  { %2694 = vmatmul.mubr.msk.f32.vlgmr.msra.gmra.mrb[14].mxu1 %vm79_vm1, %v992_v26 }
 0xa4f   :  { %2930 = vmatpush3.bf16.msra.mxu1 %v3258_v19  ;;  %2711 = vmatprep.mubr.msk.f32.mxu1 %vm3119_vm0, %v3120_v1 }
 0xa50   :  { %2931 = vmatprep.subr.bf16.mxu1 %v3118_v0 }
 0xa53   :  { %2933 = vmatpush3.bf16.msra.mxu1 %v3273_v23 }
 0xa54   :  { %2940 = vmatprep.subr.bf16.mxu1 %v3118_v0 }
 0xb21   :  { %v1062_v27 = vpop.f32.mrb[14].mxu1 }
 0xb22   :  { %v1063_v28 = vadd.f32 %v3247_v12, %v1062_v27  ;;  %v2695_v30 = vpop.f32.mrb[15].mxu1 }
 0xb24   :  { %v1066_v31 = vsub.f32 %v3255_v15, %v1063_v28 }
 0xb26   :  { %1068 = vrot.lane.b32.xlu1 %v1066_v31, %s3124_s27  ;;  %2701 = vmatmul.mubr.msk.f32.vlgmr.msra.gmra.mrb[10].mxu0 %vm154_vm2, %v1066_v31 }
 0xb27   :  { %2936 = vmatpush3.bf16.msra.mxu0 %v3213_v5  ;;  %2722 = vmatprep.mubr.msk.f32.mxu0 %vm3119_vm0, %v3120_v1 }
 0xb28   :  { %2937 = vmatprep.subr.bf16.mxu0 %v3118_v0 }
 0xb2b   :  { %2939 = vmatpush3.bf16.msra.mxu0 %v3219_v7 }
 0xb2c   :  { %2943 = vmatprep.subr.bf16.mxu0 %v3118_v0 }
 0xb98   :  { %v1069_v32 = vpop.permute.xlu1 %1068 }
 0xb99   :  { %1072 = vst.msk [vmem:[#allocation8] sm:$0xff] %vm1071_vm6, %v1069_v32 }
 0xbf9   :  { %v1141_v33 = vpop.f32.mrb[10].mxu0 }
 0xbfa   :  { %v1142_v34 = vadd.f32 %v3280_v24, %v1141_v33  ;;  %v2702_v35 = vpop.f32.mrb[11].mxu0 }
 0xbfc   :  { %v1145_v36 = vadd.f32 %v1142_v34, %v992_v26 }
 0xbfe   :  { %2712 = vmatmul.mubr.msk.f32.vlgmr.msra.gmra.mrb[16].mxu1 %vm79_vm1, %v1145_v36 }
 0xbff   :  { %2942 = vmatpush3.bf16.msra.mxu1 %v3240_v11  ;;  %2729 = vmatprep.mubr.msk.f32.mxu1 %vm3119_vm0, %v3120_v1 }
 0xc00   :  { %2949 = vmatprep.subr.bf16.mxu1 %v3118_v0 }
 0xcd1   :  { %v1215_v37 = vpop.f32.mrb[16].mxu1 }
 0xcd2   :  { %v1216_v38 = vadd.f32 %v3291_v29, %v1215_v37  ;;  %v2713_v39 = vpop.f32.mrb[17].mxu1 }
 0xcd4   :  { %v1219_v40 = vmax.f32 %v1216_v38, 0.0 }
 0xcd6   :  { %v1220_v41 = vadd.f32 %v1219_v40, %v1145_v36 }
 0xcd8   :  { %v1221_v42 = vmax.f32 %v1220_v41, 0.0 }
 0xcda   :  { %2723 = vmatmul.mubr.msk.f32.vlgmr.msra.gmra.mrb[12].mxu0 %vm79_vm1, %v1221_v42 }
 0xcdb   :  { %2945 = vmatpush3.bf16.msra.mxu0 %v3258_v19  ;;  %2740 = vmatprep.mubr.msk.f32.mxu0 %vm3119_vm0, %v3120_v1 }
 0xcdc   :  { %2946 = vmatprep.subr.bf16.mxu0 %v3118_v0 }
 0xcdf   :  { %2948 = vmatpush3.bf16.msra.mxu0 %v3273_v23 }
 0xce0   :  { %2955 = vmatprep.subr.bf16.mxu0 %v3118_v0 }
 0xdad   :  { %v1291_v43 = vpop.f32.mrb[12].mxu0 }
 0xdae   :  { %v1292_v44 = vadd.f32 %v3247_v12, %v1291_v43  ;;  %v2724_v45 = vpop.f32.mrb[13].mxu0 }
 0xdb0   :  { %v1295_v46 = vsub.f32 %v3255_v15, %v1292_v44 }
 0xdb2   :  { %1297 = vrot.lane.b32.xlu0 %v1295_v46, %s3125_s28  ;;  %2730 = vmatmul.mubr.msk.f32.vlgmr.msra.gmra.mrb[18].mxu1 %vm154_vm2, %v1295_v46 }
 0xdb3   :  { %2951 = vmatpush3.bf16.msra.mxu1 %v3213_v5  ;;  %2751 = vmatprep.mubr.msk.f32.mxu1 %vm3119_vm0, %v3120_v1 }
 0xdb4   :  { %2952 = vmatprep.subr.bf16.mxu1 %v3118_v0 }
 0xdb7   :  { %2954 = vmatpush3.bf16.msra.mxu1 %v3219_v7 }
 0xdb8   :  { %2958 = vmatprep.subr.bf16.mxu1 %v3118_v0 }
 0xe24   :  { %v1298_v47 = vpop.permute.xlu0 %1297 }
 0xe25   :  { %1301 = vst.msk [vmem:[#allocation8] sm:$0xff] %vm1300_vm7, %v1298_v47 }
 0xe85   :  { %v1370_v48 = vpop.f32.mrb[18].mxu1 }
 0xe86   :  { %v1371_v49 = vadd.f32 %v3280_v24, %v1370_v48  ;;  %v2731_v50 = vpop.f32.mrb[19].mxu1 }
 0xe88   :  { %v1374_v51 = vadd.f32 %v1371_v49, %v1221_v42 }
 0xe8a   :  { %2741 = vmatmul.mubr.msk.f32.vlgmr.msra.gmra.mrb[14].mxu0 %vm79_vm1, %v1374_v51 }
 0xe8b   :  { %2957 = vmatpush3.bf16.msra.mxu0 %v3240_v11  ;;  %2758 = vmatprep.mubr.msk.f32.mxu0 %vm3119_vm0, %v3120_v1 }
 0xe8c   :  { %2964 = vmatprep.subr.bf16.mxu0 %v3118_v0 }
 0xf5d   :  { %v1444_v52 = vpop.f32.mrb[14].mxu0 }
 0xf5e   :  { %v1445_v53 = vadd.f32 %v3291_v29, %v1444_v52  ;;  %v2742_v54 = vpop.f32.mrb[15].mxu0 }
 0xf60   :  { %v1448_v55 = vmax.f32 %v1445_v53, 0.0 }
 0xf62   :  { %v1449_v56 = vadd.f32 %v1448_v55, %v1374_v51 }
 0xf64   :  { %v1450_v57 = vmax.f32 %v1449_v56, 0.0 }
 0xf66   :  { %2752 = vmatmul.mubr.msk.f32.vlgmr.msra.gmra.mrb[20].mxu1 %vm79_vm1, %v1450_v57 }
 0xf67   :  { %2960 = vmatpush3.bf16.msra.mxu1 %v3258_v19  ;;  %2769 = vmatprep.mubr.msk.f32.mxu1 %vm3119_vm0, %v3120_v1 }
 0xf68   :  { %2961 = vmatprep.subr.bf16.mxu1 %v3118_v0 }
 0xf6b   :  { %2963 = vmatpush3.bf16.msra.mxu1 %v3273_v23 }
 0xf6c   :  { %2970 = vmatprep.subr.bf16.mxu1 %v3118_v0 }
0x1039   :  { %v1520_v58 = vpop.f32.mrb[20].mxu1 }
0x103a   :  { %v1521_v59 = vadd.f32 %v3247_v12, %v1520_v58  ;;  %v2753_v60 = vpop.f32.mrb[21].mxu1 }
0x103c   :  { %v1524_v61 = vsub.f32 %v3255_v15, %v1521_v59 }
0x103e   :  { %1526 = vrot.lane.b32.xlu1 %v1524_v61, %s3126_s29  ;;  %2759 = vmatmul.mubr.msk.f32.vlgmr.msra.gmra.mrb[16].mxu0 %vm154_vm2, %v1524_v61 }
0x103f   :  { %2966 = vmatpush3.bf16.msra.mxu0 %v3213_v5  ;;  %2780 = vmatprep.mubr.msk.f32.mxu0 %vm3119_vm0, %v3120_v1 }
0x1040   :  { %2967 = vmatprep.subr.bf16.mxu0 %v3118_v0 }
0x1043   :  { %2969 = vmatpush3.bf16.msra.mxu0 %v3219_v7 }
0x1044   :  { %2973 = vmatprep.subr.bf16.mxu0 %v3118_v0 }
0x10b0   :  { %v1527_v62 = vpop.permute.xlu1 %1526 }
0x10b1   :  { %1530 = vst.msk [vmem:[#allocation8] sm:$0xff] %vm1529_vm8, %v1527_v62 }
0x1111   :  { %v1599_v63 = vpop.f32.mrb[16].mxu0 }
0x1112   :  { %v1600_v2 = vadd.f32 %v3280_v24, %v1599_v63  ;;  %v2760_v3 = vpop.f32.mrb[17].mxu0 }
0x1114   :  { %v1603_v4 = vadd.f32 %v1600_v2, %v1450_v57 }
0x1116   :  { %2770 = vmatmul.mubr.msk.f32.vlgmr.msra.gmra.mrb[22].mxu1 %vm79_vm1, %v1603_v4 }
0x1117   :  { %2972 = vmatpush3.bf16.msra.mxu1 %v3240_v11  ;;  %2787 = vmatprep.mubr.msk.f32.mxu1 %vm3119_vm0, %v3120_v1 }
0x1118   :  { %2979 = vmatprep.subr.bf16.mxu1 %v3118_v0 }
0x11e9   :  { %v1673_v6 = vpop.f32.mrb[22].mxu1 }
0x11ea   :  { %v1674_v8 = vadd.f32 %v3291_v29, %v1673_v6  ;;  %v2771_v9 = vpop.f32.mrb[23].mxu1 }
0x11ec   :  { %v1677_v10 = vmax.f32 %v1674_v8, 0.0 }
0x11ee   :  { %v1678_v13 = vadd.f32 %v1677_v10, %v1603_v4 }
0x11f0   :  { %v1679_v14 = vmax.f32 %v1678_v13, 0.0 }
0x11f2   :  { %2781 = vmatmul.mubr.msk.f32.vlgmr.msra.gmra.mrb[18].mxu0 %vm79_vm1, %v1679_v14 }
0x11f3   :  { %2975 = vmatpush3.bf16.msra.mxu0 %v3258_v19  ;;  %2798 = vmatprep.mubr.msk.f32.mxu0 %vm3119_vm0, %v3120_v1 }
0x11f4   :  { %2976 = vmatprep.subr.bf16.mxu0 %v3118_v0 }
0x11f7   :  { %2978 = vmatpush3.bf16.msra.mxu0 %v3273_v23 }
0x11f8   :  { %2985 = vmatprep.subr.bf16.mxu0 %v3118_v0 }
0x12c5   :  { %v1749_v16 = vpop.f32.mrb[18].mxu0 }
0x12c6   :  { %v1750_v17 = vadd.f32 %v3247_v12, %v1749_v16  ;;  %v2782_v18 = vpop.f32.mrb[19].mxu0 }
0x12c8   :  { %v1753_v20 = vsub.f32 %v3255_v15, %v1750_v17 }
0x12ca   :  { %1755 = vrot.lane.b32.xlu0 %v1753_v20, %s3127_s30  ;;  %2788 = vmatmul.mubr.msk.f32.vlgmr.msra.gmra.mrb[24].mxu1 %vm154_vm2, %v1753_v20 }
0x12cb   :  { %2981 = vmatpush3.bf16.msra.mxu1 %v3213_v5  ;;  %2809 = vmatprep.mubr.msk.f32.mxu1 %vm3119_vm0, %v3120_v1 }
0x12cc   :  { %2982 = vmatprep.subr.bf16.mxu1 %v3118_v0 }
0x12cf   :  { %2984 = vmatpush3.bf16.msra.mxu1 %v3219_v7 }
0x12d0   :  { %2988 = vmatprep.subr.bf16.mxu1 %v3118_v0 }
0x133c   :  { %v1756_v21 = vpop.permute.xlu0 %1755 }
0x133d   :  { %1759 = vst.msk [vmem:[#allocation8] sm:$0xff] %vm1758_vm9, %v1756_v21 }
0x139d   :  { %v1828_v22 = vpop.f32.mrb[24].mxu1 }
0x139e   :  { %v1829_v25 = vadd.f32 %v3280_v24, %v1828_v22  ;;  %v2789_v26 = vpop.f32.mrb[25].mxu1 }
0x13a0   :  { %v1832_v27 = vadd.f32 %v1829_v25, %v1679_v14 }
0x13a2   :  { %2799 = vmatmul.mubr.msk.f32.vlgmr.msra.gmra.mrb[20].mxu0 %vm79_vm1, %v1832_v27 }
0x13a3   :  { %2987 = vmatpush3.bf16.msra.mxu0 %v3240_v11  ;;  %2816 = vmatprep.mubr.msk.f32.mxu0 %vm3119_vm0, %v3120_v1 }
0x13a4   :  { %2994 = vmatprep.subr.bf16.mxu0 %v3118_v0 }
0x1475   :  { %v1902_v28 = vpop.f32.mrb[20].mxu0 }
0x1476   :  { %v1903_v30 = vadd.f32 %v3291_v29, %v1902_v28  ;;  %v2800_v31 = vpop.f32.mrb[21].mxu0 }
0x1478   :  { %v1906_v32 = vmax.f32 %v1903_v30, 0.0 }
0x147a   :  { %v1907_v33 = vadd.f32 %v1906_v32, %v1832_v27 }
0x147c   :  { %v1908_v34 = vmax.f32 %v1907_v33, 0.0 }
0x147e   :  { %2810 = vmatmul.mubr.msk.f32.vlgmr.msra.gmra.mrb[26].mxu1 %vm79_vm1, %v1908_v34 }
0x147f   :  { %2990 = vmatpush3.bf16.msra.mxu1 %v3258_v19  ;;  %2827 = vmatprep.mubr.msk.f32.mxu1 %vm3119_vm0, %v3120_v1 }
0x1480   :  { %2991 = vmatprep.subr.bf16.mxu1 %v3118_v0 }
0x1483   :  { %2993 = vmatpush3.bf16.msra.mxu1 %v3273_v23 }
0x1484   :  { %3000 = vmatprep.subr.bf16.mxu1 %v3118_v0 }
0x1551   :  { %v1978_v35 = vpop.f32.mrb[26].mxu1 }
0x1552   :  { %v1979_v36 = vadd.f32 %v3247_v12, %v1978_v35  ;;  %v2811_v37 = vpop.f32.mrb[27].mxu1 }
0x1554   :  { %v1982_v38 = vsub.f32 %v3255_v15, %v1979_v36 }
0x1556   :  { %1983 = vst.msk [vmem:[#allocation8 + $0x8] sm:$0xff] %vm154_vm2, %v1982_v38  ;;  %2817 = vmatmul.mubr.msk.f32.vlgmr.msra.gmra.mrb[22].mxu0 %vm154_vm2, %v1982_v38 }
0x1557   :  { %2996 = vmatpush3.bf16.msra.mxu0 %v3213_v5  ;;  %2838 = vmatprep.mubr.msk.f32.mxu0 %vm3119_vm0, %v3120_v1 }
0x1558   :  { %2997 = vmatprep.subr.bf16.mxu0 %v3118_v0 }
0x155b   :  { %2999 = vmatpush3.bf16.msra.mxu0 %v3219_v7 }
0x155c   :  { %3003 = vmatprep.subr.bf16.mxu0 %v3118_v0 }
0x1629   :  { %v2053_v39 = vpop.f32.mrb[22].mxu0 }
0x162a   :  { %v2054_v40 = vadd.f32 %v3280_v24, %v2053_v39  ;;  %v2818_v41 = vpop.f32.mrb[23].mxu0 }
0x162c   :  { %v2057_v42 = vadd.f32 %v2054_v40, %v1908_v34 }
0x162e   :  { %2828 = vmatmul.mubr.msk.f32.vlgmr.msra.gmra.mrb[28].mxu1 %vm79_vm1, %v2057_v42 }
0x162f   :  { %3002 = vmatpush3.bf16.msra.mxu1 %v3240_v11  ;;  %2845 = vmatprep.mubr.msk.f32.mxu1 %vm3119_vm0, %v3120_v1 }
0x1701   :  { %v2127_v5 = vpop.f32.mrb[28].mxu1 }
0x1702   :  { %v2128_v43 = vadd.f32 %v3291_v29, %v2127_v5  ;;  %v2829_v44 = vpop.f32.mrb[29].mxu1 }
0x1704   :  { %v2131_v45 = vmax.f32 %v2128_v43, 0.0 }
0x1706   :  { %v2132_v7 = vadd.f32 %v2131_v45, %v2057_v42 }
0x1708   :  { %v2133_v46 = vmax.f32 %v2132_v7, 0.0 }
0x170a   :  { %2134 = vst.msk [vmem:[#allocation6] sm:$0xff] %vm79_vm1, %v2133_v46  ;;  %2839 = vmatmul.mubr.msk.f32.vlgmr.msra.gmra.mrb[24].mxu0 %vm79_vm1, %v2133_v46 }
0x170b   :  { %3005 = vmatpush3.bf16.msra.mxu0 %v3258_v19  ;;  %2856 = vmatprep.mubr.msk.f32.mxu0 %vm3119_vm0, %v3120_v1 }
0x170c   :  { %3006 = vmatprep.subr.bf16.mxu0 %v3118_v0 }
0x170f   :  { %3008 = vmatpush3.bf16.msra.mxu0 %v3273_v23 }
0x17dd   :  { %v2204_v11 = vpop.f32.mrb[24].mxu0 }
0x17de   :  { %v2205_v47 = vadd.f32 %v3247_v12, %v2204_v11  ;;  %v2840_v48 = vpop.f32.mrb[25].mxu0 }
0x17e0   :  { %v2208_v49 = vsub.f32 %v3255_v15, %v2205_v47 }
0x17e2   :  { %2210 = vrot.lane.b32.xlu1 %v2208_v49, %s3121_s5  ;;  %2846 = vmatmul.mubr.msk.f32.vlgmr.msra.gmra.mrb[30].mxu1 %vm154_vm2, %v2208_v49 }
0x1854   :  { %v2211_v50 = vpop.permute.xlu1 %2210 }
0x1855   :  { %2213 = vst.msk [vmem:[#allocation8 + $0x8] sm:$0xff] %vm384_vm3, %v2211_v50 }
0x18b5   :  { %v2282_v19 = vpop.f32.mrb[30].mxu1 }
0x18b6   :  { %v2283_v1 = vadd.f32 %v3280_v24, %v2282_v19  ;;  %v2847_v51 = vpop.f32.mrb[31].mxu1 }
0x18b8   :  { %v2286_v0 = vadd.f32 %v2283_v1, %v2133_v46 }
0x18ba   :  { %2857 = vmatmul.mubr.msk.f32.vlgmr.msra.gmra.mrb[26].mxu0 %vm79_vm1, %v2286_v0 }
0x18bb   :  { %3056 = shalt.err (!%p3053_p12)
}
0x18bc   :  { %s3057_s0 = scalar_lea.hbm %s3541_s9, 128 }
0x18bd   :  { %p3058_p13 = scmp.ne.s32.totalorder %s3541_s9, %s3057_s0  ;;  %p3061_p0 = scmp.lt.u32.totalorder %s3057_s0, %s3541_s9 }
0x18bf   :  { %p3063_p1 = pnand %p3061_p0, %p3058_p13 }
0x18c1   :  { %3066 = shalt.err (!%p3063_p1)
}
0x18c2   :  { %2383 = dma.vmem_to_hbm [thread:$0]  %s2381_s12, 128, %s3541_s9, [#allocation7]  }
0x18c3   :  { %s3129_s21 = smov [#allocation8]  }
0x18c4   :  { %s2390_s3 = sshll.u32 %s3129_s21, 4  ;;  %s2391_s3 = int_to_ptr.vmem [resolvable:$true] %s2390_s3 }
0x18c5   :  { %s3067_s4 = scalar_lea.vmem %s2391_s3, 256  ;;  %p3072_p3 = scmp.lt.s32.totalorder %s2391_s3, %s2391_s3 }
0x18c6   :  { %p3068_p2 = scmp.ne.s32.totalorder %s2391_s3, %s3067_s4  ;;  %p3073_p4 = scmp.lt.s32.totalorder %s3067_s4, %s3067_s4 }
0x18c8   :  { %p3074_p5 = por %p3073_p4, %p3072_p3 }
0x18ca   :  { %p3075_p6 = pnand %p3074_p5, %p3068_p2 }
0x18cc   :  { %3078 = shalt.err (!%p3075_p6)
}
0x18cd   :  { %s3079_s24 = scalar_lea.hbm %s3542_s10, 256 }
0x18ce   :  { %p3080_p7 = scmp.ne.s32.totalorder %s3542_s10, %s3079_s24  ;;  %p3083_p8 = scmp.lt.u32.totalorder %s3079_s24, %s3542_s10 }
0x18d0   :  { %p3085_p9 = pnand %p3083_p8, %p3080_p7 }
0x18d2   :  { %3088 = shalt.err (!%p3085_p9)
}
0x18d3   :  { %2393 = dma.vmem_to_hbm [thread:$0]  %s2391_s3, 256, %s3542_s10, [#allocation7]  }
0x18d4   :  { %s3130_s1 = smov [#allocation5]  }
0x18d5   :  { %s2370_s27 = sshll.u32 %s3130_s1, 4  ;;  %s2371_s27 = int_to_ptr.vmem [resolvable:$true] %s2370_s27 }
0x18d6   :  { %s3089_s28 = scalar_lea.vmem %s2371_s27, 128  ;;  %p3094_p11 = scmp.lt.s32.totalorder %s2371_s27, %s2371_s27 }
0x18d7   :  { %p3090_p10 = scmp.ne.s32.totalorder %s2371_s27, %s3089_s28  ;;  %p3095_p12 = scmp.lt.s32.totalorder %s3089_s28, %s3089_s28 }
0x18d9   :  { %p3096_p13 = por %p3095_p12, %p3094_p11 }
0x18db   :  { %p3097_p0 = pnand %p3096_p13, %p3090_p10 }
0x198d   :  { %v2356_v12 = vpop.f32.mrb[26].mxu0 }
0x198e   :  { %v2357_v15 = vadd.f32 %v3291_v29, %v2356_v12  ;;  %v2858_v23 = vpop.f32.mrb[27].mxu0 }
0x1990   :  { %v2360_v24 = vmax.f32 %v2357_v15, 0.0 }
0x1992   :  { %v2361_v52 = vadd.f32 %v2360_v24, %v2286_v0 }
0x1994   :  { %v2362_v53 = vmax.f32 %v2361_v52, 0.0 }
0x1996   :  { %2363 = vst.msk [vmem:[#allocation5] sm:$0xff] %vm79_vm1, %v2362_v53 }
0x1997   :  { %3100 = shalt.err (!%p3097_p0)
}
0x1998   :  { %s3101_s30 = scalar_lea.hbm %s3540_s8, 128 }
0x1999   :  { %p3102_p1 = scmp.ne.s32.totalorder %s3540_s8, %s3101_s30  ;;  %p3105_p2 = scmp.lt.u32.totalorder %s3101_s30, %s3540_s8 }
0x199b   :  { %p3107_p3 = pnand %p3105_p2, %p3102_p1 }
0x199d   :  { %3110 = shalt.err (!%p3107_p3)
}
0x199e   :  { %2373 = dma.vmem_to_hbm [thread:$0]  %s2371_s27, 128, %s3540_s8, [#allocation4]  }
0x199f   :  { %3113 = dma.done.wait [#allocation4], 128  }
0x19a0   :  { %3114 = vsyncadd [#allocation4], 4294967168 }
0x19a1   :  { %3115 = dma.done.wait [#allocation7], 384  }
0x19a2   :  { %3116 = vsyncadd [#allocation7], 4294966912 }
0x19a3   :  { %2403 = vsyncpa [#allocation3], 1 }
0x19a4   :  { %2404 = vsyncpa [#allocation4], 1 }
0x19a5   :  { %2405 = vsyncpa [#allocation7], 1 }

// kernel: tpu_custom_call.1
= control target key start
LH: loop header
LB: loop body
LE: loop exit
PB: predicated region body
PF: predicated region fallthrough
CT: control target
= control target key end

     0   :  { %16 = vsyncpa [#allocation3], 0  ;;  %s3532_s0 = inlined_call_operand.vmem [shape: f32[8,32], index: 0, kind: input, shape index: {}]   ;;  %s3533_s1 = inlined_call_operand.hbm [shape: f32[8,16], index: 1, kind: input, shape index: {}]   ;;  %s3534_s2 = inlined_call_operand.vmem [shape: f32[32,16], index: 2, kind: input, shape index: {}]   ;;  %s3535_s3 = inlined_call_operand.vmem [shape: f32[1,16], index: 3, kind: input, shape index: {}]   ;;  %s3536_s4 = inlined_call_operand.vmem [shape: f32[16,32], index: 4, kind: input, shape index: {}]   ;;  %s3537_s5 = inlined_call_operand.vmem [shape: f32[1,32], index: 5, kind: input, shape index: {}]   ;;  %s3538_s6 = inlined_call_operand.vmem [shape: f32[32,32], index: 6, kind: input, shape index: {}]   ;;  %s3539_s7 = inlined_call_operand.vmem [shape: f32[1,32], index: 7, kind: input, shape index: {}]   ;;  %s3540_s8 = inlined_call_operand.hbm [shape: f32[8,32], index: 8, kind: output, shape index: {0}]   ;;  %s3541_s9 = inlined_call_operand.hbm [shape: f32[8,32], index: 9, kind: output, shape index: {1}]   ;;  %s3542_s10 = inlined_call_operand.hbm [shape: f32[8,160], index: 10, kind: output, shape index: {2}]  }
   0x1   :  { %17 = vsyncpa [#allocation4], 0 }
   0x2   :  { %18 = vsyncpa [#allocation7], 0  ;;  %s3117_s13 = smov [#allocation2]   ;;  %s3023_s17 = scalar_lea.hbm %s3533_s1, 128 }
   0x3   :  { %s27_s14 = sshll.u32 %s3117_s13, 4  ;;  %p3024_p0 = scmp.ne.s32.totalorder %s3533_s1, %s3023_s17  ;;  %s28_s14 = int_to_ptr.vmem [resolvable:$true] %s27_s14 }
   0x4   :  { %p3027_p1 = scmp.lt.u32.totalorder %s3023_s17, %s3533_s1 }
   0x6   :  { %p3029_p2 = pnand %p3027_p1, %p3024_p0 }
   0x8   :  { %3032 = shalt.err (!%p3029_p2)
}
   0x9   :  { %s3033_s22 = scalar_lea.vmem %s28_s14, 128  ;;  %p3038_p4 = scmp.lt.s32.totalorder %s28_s14, %s28_s14 }
   0xa   :  { %p3034_p3 = scmp.ne.s32.totalorder %s28_s14, %s3033_s22  ;;  %p3039_p5 = scmp.lt.s32.totalorder %s3033_s22, %s3033_s22 }
   0xc   :  { %p3040_p6 = por %p3039_p5, %p3038_p4 }
   0xe   :  { %p3041_p7 = pnand %p3040_p6, %p3034_p3 }
  0x10   :  { %3044 = shalt.err (!%p3041_p7)
}
  0x11   :  { %30 = dma.hbm_to_vmem [thread:$0]  %s3533_s1, 128, %s28_s14, [#allocation3]  }
  0x12   :  { %3111 = dma.done.wait [#allocation3], 128  }
  0x13   :  { %3112 = vsyncadd [#allocation3], 4294967168  ;;  %v3118_v0 = vmov 0.0|0.0   ;;  %vm3119_vm0 = vmmov 0   ;;  %v3120_v1 = vmov 0.0   ;;  %v46_v2 = vld [vmem:[%s3534_s2] sm:$0xff] }
  0x14   :  { %2859 = vmatprep.subr.bf16.mxu0 %v3118_v0  ;;  %2577 = vmatprep.mubr.msk.f32.mxu0 %vm3119_vm0, %v3120_v1  ;;  %v47_v3 = vld [vmem:[%s3534_s2 + $0x8] sm:$0xff]  ;;  %v48_v4 = vld [vmem:[%s3534_s2 + $0x10] sm:$0xff]  ;;  %v49_v6 = vld [vmem:[%s3534_s2 + $0x18] sm:$0xff]  ;;  %vm79_vm1 = vcmask 261120   ;;  %vm154_vm2 = vcmask 130048   ;;  %vm384_vm3 = vcmask 261248  }
  0x15   :  { %2865 = vmatprep.subr.bf16.mxu1 %v3118_v0  ;;  %2584 = vmatprep.mubr.msk.f32.mxu1 %vm3119_vm0, %v3120_v1  ;;  %v3213_v5 = vpack.c.bf16 %v47_v3, %v46_v2  ;;  %v3219_v7 = vpack.c.bf16 %v49_v6, %v48_v4  ;;  %v77_v8 = vld [vmem:[%s3532_s0] sm:$0xff]  ;;  %v51_v10 = vld [vmem:[%s3536_s4 + $0x8] sm:$0xff]  ;;  %v54_v21 = vld [vmem:[%s3538_s6 + $0x10] sm:$0xff]  ;;  %vm613_vm4 = vcmask 392448   ;;  %s3123_s1 = smov 48   ;;  %vm842_vm5 = vcmask 523648  }
  0x16   :  { %v50_v9 = vld [vmem:[%s3536_s4] sm:$0xff]  ;;  %v53_v14 = vld [vmem:[%s3538_s6 + $0x8] sm:$0xff]  ;;  %v55_v22 = vld [vmem:[%s3538_s6 + $0x18] sm:$0xff]  ;;  %s3124_s27 = smov 64   ;;  %vm1071_vm6 = vcmask 654848   ;;  %s3125_s28 = smov 80  }
  0x17   :  { %2861 = vmatpush3.bf16.msra.mxu0 %v3213_v5  ;;  %v3240_v11 = vpack.c.bf16 %v51_v10, %v50_v9  ;;  %v3247_v12 = vld [vmem:[%s3535_s3] ss:$0 sm:$0xff]  ;;  %v3273_v23 = vpack.c.bf16 %v55_v22, %v54_v21  ;;  %vm1300_vm7 = vcmask 786048   ;;  %s3126_s29 = smov 96   ;;  %vm1529_vm8 = vcmask 917248   ;;  %s3127_s30 = smov 112  }
  0x18   :  { %2862 = vmatprep.subr.bf16.mxu0 %v3118_v0  ;;  %v52_v13 = vld [vmem:[%s3538_s6] sm:$0xff]  ;;  %vm1758_vm9 = vcmask 1048448   ;;  %s3128_s11 = smov [#allocation6]  }
  0x19   :  { %2867 = vmatpush3.bf16.msra.mxu1 %v3240_v11  ;;  %v3255_v15 = vld [vmem:[#allocation2] sm:$0xff]  ;;  %v3258_v19 = vpack.c.bf16 %v53_v14, %v52_v13  ;;  %s2380_s12 = sshll.u32 %s3128_s11, 4  ;;  %s2381_s12 = int_to_ptr.vmem [resolvable:$true] %s2380_s12 }
  0x1a   :  { %2868 = vmatprep.subr.bf16.mxu1 %v3118_v0  ;;  %v3280_v24 = vld [vmem:[%s3537_s5] ss:$0 sm:$0xff]  ;;  %s3121_s5 = smov 16   ;;  %s3045_s13 = scalar_lea.vmem %s2381_s12, 128 }
  0x1b   :  { %2864 = vmatpush3.bf16.msra.mxu0 %v3219_v7  ;;  %v3291_v29 = vld [vmem:[%s3539_s7] ss:$0 sm:$0xff]  ;;  %s3122_s7 = smov 32   ;;  %p3046_p8 = scmp.ne.s32.totalorder %s2381_s12, %s3045_s13 }
  0x1c   :  { %2874 = vmatprep.subr.bf16.mxu0 %v3118_v0  ;;  %p3050_p9 = scmp.lt.s32.totalorder %s2381_s12, %s2381_s12  ;;  %p3051_p10 = scmp.lt.s32.totalorder %s3045_s13, %s3045_s13 }
  0x1e   :  { %2578 = vmatmul.mubr.msk.f32.vlgmr.msra.gmra.mrb[0].mxu0 %vm79_vm1, %v77_v8  ;;  %p3052_p11 = por %p3051_p10, %p3050_p9 }
  0x1f   :  { %2876 = vmatpush3.bf16.msra.mxu0 %v3213_v5  ;;  %2606 = vmatprep.mubr.msk.f32.mxu0 %vm3119_vm0, %v3120_v1 }
  0x20   :  { %2877 = vmatprep.subr.bf16.mxu0 %v3118_v0  ;;  %p3053_p12 = pnand %p3052_p11, %p3046_p8 }
  0x23   :  { %2879 = vmatpush3.bf16.msra.mxu0 %v3219_v7 }
  0x24   :  { %2883 = vmatprep.subr.bf16.mxu0 %v3118_v0 }
  0xf1   :  { %v149_v16 = vpop.f32.mrb[0].mxu0 }
  0xf2   :  { %v150_v17 = vadd.f32 %v3247_v12, %v149_v16  ;;  %v2579_v18 = vpop.f32.mrb[1].mxu0 }
  0xf4   :  { %v153_v20 = vsub.f32 %v3255_v15, %v150_v17 }
  0xf6   :  { %155 = vst.msk [vmem:[#allocation8] sm:$0xff] %vm154_vm2, %v153_v20  ;;  %2585 = vmatmul.mubr.msk.f32.vlgmr.msra.gmra.mrb[0].mxu1 %vm154_vm2, %v153_v20 }
  0xf7   :  { %2870 = vmatpush3.bf16.msra.mxu1 %v3258_v19  ;;  %2595 = vmatprep.mubr.msk.f32.mxu1 %vm3119_vm0, %v3120_v1 }
  0xf8   :  { %2871 = vmatprep.subr.bf16.mxu1 %v3118_v0 }
  0xfb   :  { %2873 = vmatpush3.bf16.msra.mxu1 %v3273_v23 }
  0xfc   :  { %2880 = vmatprep.subr.bf16.mxu1 %v3118_v0 }
 0x1c9   :  { %v225_v25 = vpop.f32.mrb[0].mxu1 }
 0x1ca   :  { %v226_v26 = vadd.f32 %v3280_v24, %v225_v25  ;;  %v2586_v27 = vpop.f32.mrb[1].mxu1 }
 0x1cc   :  { %v229_v28 = vadd.f32 %v226_v26, %v77_v8 }
 0x1ce   :  { %2596 = vmatmul.mubr.msk.f32.vlgmr.msra.gmra.mrb[2].mxu1 %vm79_vm1, %v229_v28 }
 0x1cf   :  { %2882 = vmatpush3.bf16.msra.mxu1 %v3240_v11  ;;  %2613 = vmatprep.mubr.msk.f32.mxu1 %vm3119_vm0, %v3120_v1 }
 0x1d0   :  { %2889 = vmatprep.subr.bf16.mxu1 %v3118_v0 }
 0x2a1   :  { %v299_v30 = vpop.f32.mrb[2].mxu1 }
 0x2a2   :  { %v300_v31 = vadd.f32 %v3291_v29, %v299_v30  ;;  %v2597_v32 = vpop.f32.mrb[3].mxu1 }
 0x2a4   :  { %v303_v33 = vmax.f32 %v300_v31, 0.0 }
 0x2a6   :  { %v304_v34 = vadd.f32 %v303_v33, %v229_v28 }
 0x2a8   :  { %v305_v35 = vmax.f32 %v304_v34, 0.0 }
 0x2aa   :  { %2607 = vmatmul.mubr.msk.f32.vlgmr.msra.gmra.mrb[2].mxu0 %vm79_vm1, %v305_v35 }
 0x2ab   :  { %2885 = vmatpush3.bf16.msra.mxu0 %v3258_v19  ;;  %2624 = vmatprep.mubr.msk.f32.mxu0 %vm3119_vm0, %v3120_v1 }
 0x2ac   :  { %2886 = vmatprep.subr.bf16.mxu0 %v3118_v0 }
 0x2af   :  { %2888 = vmatpush3.bf16.msra.mxu0 %v3273_v23 }
 0x2b0   :  { %2904 = vmatprep.subr.bf16.mxu0 %v3118_v0 }
 0x37d   :  { %v375_v36 = vpop.f32.mrb[2].mxu0 }
 0x37e   :  { %v376_v37 = vadd.f32 %v3247_v12, %v375_v36  ;;  %v2608_v38 = vpop.f32.mrb[3].mxu0 }
 0x380   :  { %v379_v39 = vsub.f32 %v3255_v15, %v376_v37 }
 0x382   :  { %381 = vrot.lane.b32.xlu0 %v379_v39, %s3121_s5  ;;  %2614 = vmatmul.mubr.msk.f32.vlgmr.msra.gmra.mrb[4].mxu1 %vm154_vm2, %v379_v39 }
 0x383   :  { %2891 = vmatpush3.bf16.msra.mxu1 %v3213_v5  ;;  %2635 = vmatprep.mubr.msk.f32.mxu1 %vm3119_vm0, %v3120_v1 }
 0x384   :  { %2892 = vmatprep.subr.bf16.mxu1 %v3118_v0 }
 0x387   :  { %2894 = vmatpush3.bf16.msra.mxu1 %v3219_v7 }
 0x388   :  { %2895 = vmatprep.subr.bf16.mxu1 %v3118_v0 }
 0x3f4   :  { %v382_v40 = vpop.permute.xlu0 %381 }
 0x3f5   :  { %385 = vst.msk [vmem:[#allocation8] sm:$0xff] %vm384_vm3, %v382_v40 }
 0x455   :  { %v454_v41 = vpop.f32.mrb[4].mxu1 }
 0x456   :  { %v455_v42 = vadd.f32 %v3280_v24, %v454_v41  ;;  %v2615_v43 = vpop.f32.mrb[5].mxu1 }
 0x458   :  { %v458_v44 = vadd.f32 %v455_v42, %v305_v35 }
 0x45a   :  { %2625 = vmatmul.mubr.msk.f32.vlgmr.msra.gmra.mrb[4].mxu0 %vm79_vm1, %v458_v44 }
 0x45b   :  { %2906 = vmatpush3.bf16.msra.mxu0 %v3213_v5  ;;  %2664 = vmatprep.mubr.msk.f32.mxu0 %vm3119_vm0, %v3120_v1 }
 0x45c   :  { %2907 = vmatprep.subr.bf16.mxu0 %v3118_v0 }
 0x45f   :  { %2909 = vmatpush3.bf16.msra.mxu0 %v3219_v7 }
 0x460   :  { %2913 = vmatprep.subr.bf16.mxu0 %v3118_v0 }
 0x52d   :  { %v528_v45 = vpop.f32.mrb[4].mxu0 }
 0x52e   :  { %v529_v46 = vadd.f32 %v3291_v29, %v528_v45  ;;  %v2626_v47 = vpop.f32.mrb[5].mxu0 }
 0x530   :  { %v532_v48 = vmax.f32 %v529_v46, 0.0 }
 0x532   :  { %v533_v49 = vadd.f32 %v532_v48, %v458_v44 }
 0x534   :  { %v534_v50 = vmax.f32 %v533_v49, 0.0 }
 0x536   :  { %2636 = vmatmul.mubr.msk.f32.vlgmr.msra.gmra.mrb[6].mxu1 %vm79_vm1, %v534_v50 }
 0x537   :  { %2897 = vmatpush3.bf16.msra.mxu1 %v3240_v11  ;;  %2642 = vmatprep.mubr.msk.f32.mxu1 %vm3119_vm0, %v3120_v1 }
 0x538   :  { %2898 = vmatprep.subr.bf16.mxu1 %v3118_v0 }
 0x609   :  { %v604_v51 = vpop.f32.mrb[6].mxu1 }
 0x60a   :  { %v605_v52 = vadd.f32 %v3247_v12, %v604_v51  ;;  %v2637_v53 = vpop.f32.mrb[7].mxu1 }
 0x60c   :  { %v608_v54 = vsub.f32 %v3255_v15, %v605_v52 }
 0x60e   :  { %610 = vrot.lane.b32.xlu0 %v608_v54, %s3122_s7  ;;  %2643 = vmatmul.mubr.msk.f32.vlgmr.msra.gmra.mrb[8].mxu1 %vm154_vm2, %v608_v54 }
 0x60f   :  { %2900 = vmatpush3.bf16.msra.mxu1 %v3258_v19  ;;  %2653 = vmatprep.mubr.msk.f32.mxu1 %vm3119_vm0, %v3120_v1 }
 0x610   :  { %2901 = vmatprep.subr.bf16.mxu1 %v3118_v0 }
 0x613   :  { %2903 = vmatpush3.bf16.msra.mxu1 %v3273_v23 }
 0x614   :  { %2910 = vmatprep.subr.bf16.mxu1 %v3118_v0 }
 0x680   :  { %v611_v55 = vpop.permute.xlu0 %610 }
 0x681   :  { %614 = vst.msk [vmem:[#allocation8] sm:$0xff] %vm613_vm4, %v611_v55 }
 0x6e1   :  { %v683_v56 = vpop.f32.mrb[8].mxu1 }
 0x6e2   :  { %v684_v57 = vadd.f32 %v3280_v24, %v683_v56  ;;  %v2644_v58 = vpop.f32.mrb[9].mxu1 }
 0x6e4   :  { %v687_v59 = vadd.f32 %v684_v57, %v534_v50 }
 0x6e6   :  { %2654 = vmatmul.mubr.msk.f32.vlgmr.msra.gmra.mrb[10].mxu1 %vm79_vm1, %v687_v59 }
 0x6e7   :  { %2912 = vmatpush3.bf16.msra.mxu1 %v3240_v11  ;;  %2671 = vmatprep.mubr.msk.f32.mxu1 %vm3119_vm0, %v3120_v1 }
 0x6e8   :  { %2919 = vmatprep.subr.bf16.mxu1 %v3118_v0 }
 0x7b9   :  { %v757_v60 = vpop.f32.mrb[10].mxu1 }
 0x7ba   :  { %v758_v61 = vadd.f32 %v3291_v29, %v757_v60  ;;  %v2655_v62 = vpop.f32.mrb[11].mxu1 }
 0x7bc   :  { %v761_v63 = vmax.f32 %v758_v61, 0.0 }
 0x7be   :  { %v762_v2 = vadd.f32 %v761_v63, %v687_v59 }
 0x7c0   :  { %v763_v3 = vmax.f32 %v762_v2, 0.0 }
 0x7c2   :  { %2665 = vmatmul.mubr.msk.f32.vlgmr.msra.gmra.mrb[6].mxu0 %vm79_vm1, %v763_v3 }
 0x7c3   :  { %2915 = vmatpush3.bf16.msra.mxu0 %v3258_v19  ;;  %2682 = vmatprep.mubr.msk.f32.mxu0 %vm3119_vm0, %v3120_v1 }
 0x7c4   :  { %2916 = vmatprep.subr.bf16.mxu0 %v3118_v0 }
 0x7c7   :  { %2918 = vmatpush3.bf16.msra.mxu0 %v3273_v23 }
 0x7c8   :  { %2925 = vmatprep.subr.bf16.mxu0 %v3118_v0 }
 0x895   :  { %v833_v4 = vpop.f32.mrb[6].mxu0 }
 0x896   :  { %v834_v6 = vadd.f32 %v3247_v12, %v833_v4  ;;  %v2666_v8 = vpop.f32.mrb[7].mxu0 }
 0x898   :  { %v837_v9 = vsub.f32 %v3255_v15, %v834_v6 }
 0x89a   :  { %839 = vrot.lane.b32.xlu1 %v837_v9, %s3123_s1  ;;  %2672 = vmatmul.mubr.msk.f32.vlgmr.msra.gmra.mrb[12].mxu1 %vm154_vm2, %v837_v9 }
 0x89b   :  { %2921 = vmatpush3.bf16.msra.mxu1 %v3213_v5  ;;  %2693 = vmatprep.mubr.msk.f32.mxu1 %vm3119_vm0, %v3120_v1 }
 0x89c   :  { %2922 = vmatprep.subr.bf16.mxu1 %v3118_v0 }
 0x89f   :  { %2924 = vmatpush3.bf16.msra.mxu1 %v3219_v7 }
 0x8a0   :  { %2928 = vmatprep.subr.bf16.mxu1 %v3118_v0 }
 0x90c   :  { %v840_v10 = vpop.permute.xlu1 %839 }
 0x90d   :  { %843 = vst.msk [vmem:[#allocation8] sm:$0xff] %vm842_vm5, %v840_v10 }
 0x96d   :  { %v912_v13 = vpop.f32.mrb[12].mxu1 }
 0x96e   :  { %v913_v14 = vadd.f32 %v3280_v24, %v912_v13  ;;  %v2673_v16 = vpop.f32.mrb[13].mxu1 }
 0x970   :  { %v916_v17 = vadd.f32 %v913_v14, %v763_v3 }
 0x972   :  { %2683 = vmatmul.mubr.msk.f32.vlgmr.msra.gmra.mrb[8].mxu0 %vm79_vm1, %v916_v17 }
 0x973   :  { %2927 = vmatpush3.bf16.msra.mxu0 %v3240_v11  ;;  %2700 = vmatprep.mubr.msk.f32.mxu0 %vm3119_vm0, %v3120_v1 }
 0x974   :  { %2934 = vmatprep.subr.bf16.mxu0 %v3118_v0 }
 0xa45   :  { %v986_v18 = vpop.f32.mrb[8].mxu0 }
 0xa46   :  { %v987_v20 = vadd.f32 %v3291_v29, %v986_v18  ;;  %v2684_v21 = vpop.f32.mrb[9].mxu0 }
 0xa48   :  { %v990_v22 = vmax.f32 %v987_v20, 0.0 }
 0xa4a   :  { %v991_v25 = vadd.f32 %v990_v22, %v916_v17 }
 0xa4c   :  { %v992_v26 = vmax.f32 %v991_v25, 0.0 }
 0xa4e   :  { %2694 = vmatmul.mubr.msk.f32.vlgmr.msra.gmra.mrb[14].mxu1 %vm79_vm1, %v992_v26 }
 0xa4f   :  { %2930 = vmatpush3.bf16.msra.mxu1 %v3258_v19  ;;  %2711 = vmatprep.mubr.msk.f32.mxu1 %vm3119_vm0, %v3120_v1 }
 0xa50   :  { %2931 = vmatprep.subr.bf16.mxu1 %v3118_v0 }
 0xa53   :  { %2933 = vmatpush3.bf16.msra.mxu1 %v3273_v23 }
 0xa54   :  { %2940 = vmatprep.subr.bf16.mxu1 %v3118_v0 }
 0xb21   :  { %v1062_v27 = vpop.f32.mrb[14].mxu1 }
 0xb22   :  { %v1063_v28 = vadd.f32 %v3247_v12, %v1062_v27  ;;  %v2695_v30 = vpop.f32.mrb[15].mxu1 }
 0xb24   :  { %v1066_v31 = vsub.f32 %v3255_v15, %v1063_v28 }
 0xb26   :  { %1068 = vrot.lane.b32.xlu1 %v1066_v31, %s3124_s27  ;;  %2701 = vmatmul.mubr.msk.f32.vlgmr.msra.gmra.mrb[10].mxu0 %vm154_vm2, %v1066_v31 }
 0xb27   :  { %2936 = vmatpush3.bf16.msra.mxu0 %v3213_v5  ;;  %2722 = vmatprep.mubr.msk.f32.mxu0 %vm3119_vm0, %v3120_v1 }
 0xb28   :  { %2937 = vmatprep.subr.bf16.mxu0 %v3118_v0 }
 0xb2b   :  { %2939 = vmatpush3.bf16.msra.mxu0 %v3219_v7 }
 0xb2c   :  { %2943 = vmatprep.subr.bf16.mxu0 %v3118_v0 }
 0xb98   :  { %v1069_v32 = vpop.permute.xlu1 %1068 }
 0xb99   :  { %1072 = vst.msk [vmem:[#allocation8] sm:$0xff] %vm1071_vm6, %v1069_v32 }
 0xbf9   :  { %v1141_v33 = vpop.f32.mrb[10].mxu0 }
 0xbfa   :  { %v1142_v34 = vadd.f32 %v3280_v24, %v1141_v33  ;;  %v2702_v35 = vpop.f32.mrb[11].mxu0 }
 0xbfc   :  { %v1145_v36 = vadd.f32 %v1142_v34, %v992_v26 }
 0xbfe   :  { %2712 = vmatmul.mubr.msk.f32.vlgmr.msra.gmra.mrb[16].mxu1 %vm79_vm1, %v1145_v36 }
 0xbff   :  { %2942 = vmatpush3.bf16.msra.mxu1 %v3240_v11  ;;  %2729 = vmatprep.mubr.msk.f32.mxu1 %vm3119_vm0, %v3120_v1 }
 0xc00   :  { %2949 = vmatprep.subr.bf16.mxu1 %v3118_v0 }
 0xcd1   :  { %v1215_v37 = vpop.f32.mrb[16].mxu1 }
 0xcd2   :  { %v1216_v38 = vadd.f32 %v3291_v29, %v1215_v37  ;;  %v2713_v39 = vpop.f32.mrb[17].mxu1 }
 0xcd4   :  { %v1219_v40 = vmax.f32 %v1216_v38, 0.0 }
 0xcd6   :  { %v1220_v41 = vadd.f32 %v1219_v40, %v1145_v36 }
 0xcd8   :  { %v1221_v42 = vmax.f32 %v1220_v41, 0.0 }
 0xcda   :  { %2723 = vmatmul.mubr.msk.f32.vlgmr.msra.gmra.mrb[12].mxu0 %vm79_vm1, %v1221_v42 }
 0xcdb   :  { %2945 = vmatpush3.bf16.msra.mxu0 %v3258_v19  ;;  %2740 = vmatprep.mubr.msk.f32.mxu0 %vm3119_vm0, %v3120_v1 }
 0xcdc   :  { %2946 = vmatprep.subr.bf16.mxu0 %v3118_v0 }
 0xcdf   :  { %2948 = vmatpush3.bf16.msra.mxu0 %v3273_v23 }
 0xce0   :  { %2955 = vmatprep.subr.bf16.mxu0 %v3118_v0 }
 0xdad   :  { %v1291_v43 = vpop.f32.mrb[12].mxu0 }
 0xdae   :  { %v1292_v44 = vadd.f32 %v3247_v12, %v1291_v43  ;;  %v2724_v45 = vpop.f32.mrb[13].mxu0 }
 0xdb0   :  { %v1295_v46 = vsub.f32 %v3255_v15, %v1292_v44 }
 0xdb2   :  { %1297 = vrot.lane.b32.xlu0 %v1295_v46, %s3125_s28  ;;  %2730 = vmatmul.mubr.msk.f32.vlgmr.msra.gmra.mrb[18].mxu1 %vm154_vm2, %v1295_v46 }
 0xdb3   :  { %2951 = vmatpush3.bf16.msra.mxu1 %v3213_v5  ;;  %2751 = vmatprep.mubr.msk.f32.mxu1 %vm3119_vm0, %v3120_v1 }
 0xdb4   :  { %2952 = vmatprep.subr.bf16.mxu1 %v3118_v0 }
 0xdb7   :  { %2954 = vmatpush3.bf16.msra.mxu1 %v3219_v7 }
 0xdb8   :  { %2958 = vmatprep.subr.bf16.mxu1 %v3118_v0 }
 0xe24   :  { %v1298_v47 = vpop.permute.xlu0 %1297 }
 0xe25   :  { %1301 = vst.msk [vmem:[#allocation8] sm:$0xff] %vm1300_vm7, %v1298_v47 }
 0xe85   :  { %v1370_v48 = vpop.f32.mrb[18].mxu1 }
 0xe86   :  { %v1371_v49 = vadd.f32 %v3280_v24, %v1370_v48  ;;  %v2731_v50 = vpop.f32.mrb[19].mxu1 }
 0xe88   :  { %v1374_v51 = vadd.f32 %v1371_v49, %v1221_v42 }
 0xe8a   :  { %2741 = vmatmul.mubr.msk.f32.vlgmr.msra.gmra.mrb[14].mxu0 %vm79_vm1, %v1374_v51 }
 0xe8b   :  { %2957 = vmatpush3.bf16.msra.mxu0 %v3240_v11  ;;  %2758 = vmatprep.mubr.msk.f32.mxu0 %vm3119_vm0, %v3120_v1 }
 0xe8c   :  { %2964 = vmatprep.subr.bf16.mxu0 %v3118_v0 }
 0xf5d   :  { %v1444_v52 = vpop.f32.mrb[14].mxu0 }
 0xf5e   :  { %v1445_v53 = vadd.f32 %v3291_v29, %v1444_v52  ;;  %v2742_v54 = vpop.f32.mrb[15].mxu0 }
 0xf60   :  { %v1448_v55 = vmax.f32 %v1445_v53, 0.0 }
 0xf62   :  { %v1449_v56 = vadd.f32 %v1448_v55, %v1374_v51 }
 0xf64   :  { %v1450_v57 = vmax.f32 %v1449_v56, 0.0 }
 0xf66   :  { %2752 = vmatmul.mubr.msk.f32.vlgmr.msra.gmra.mrb[20].mxu1 %vm79_vm1, %v1450_v57 }
 0xf67   :  { %2960 = vmatpush3.bf16.msra.mxu1 %v3258_v19  ;;  %2769 = vmatprep.mubr.msk.f32.mxu1 %vm3119_vm0, %v3120_v1 }
 0xf68   :  { %2961 = vmatprep.subr.bf16.mxu1 %v3118_v0 }
 0xf6b   :  { %2963 = vmatpush3.bf16.msra.mxu1 %v3273_v23 }
 0xf6c   :  { %2970 = vmatprep.subr.bf16.mxu1 %v3118_v0 }
0x1039   :  { %v1520_v58 = vpop.f32.mrb[20].mxu1 }
0x103a   :  { %v1521_v59 = vadd.f32 %v3247_v12, %v1520_v58  ;;  %v2753_v60 = vpop.f32.mrb[21].mxu1 }
0x103c   :  { %v1524_v61 = vsub.f32 %v3255_v15, %v1521_v59 }
0x103e   :  { %1526 = vrot.lane.b32.xlu1 %v1524_v61, %s3126_s29  ;;  %2759 = vmatmul.mubr.msk.f32.vlgmr.msra.gmra.mrb[16].mxu0 %vm154_vm2, %v1524_v61 }
0x103f   :  { %2966 = vmatpush3.bf16.msra.mxu0 %v3213_v5  ;;  %2780 = vmatprep.mubr.msk.f32.mxu0 %vm3119_vm0, %v3120_v1 }
0x1040   :  { %2967 = vmatprep.subr.bf16.mxu0 %v3118_v0 }
0x1043   :  { %2969 = vmatpush3.bf16.msra.mxu0 %v3219_v7 }
0x1044   :  { %2973 = vmatprep.subr.bf16.mxu0 %v3118_v0 }
0x10b0   :  { %v1527_v62 = vpop.permute.xlu1 %1526 }
0x10b1   :  { %1530 = vst.msk [vmem:[#allocation8] sm:$0xff] %vm1529_vm8, %v1527_v62 }
0x1111   :  { %v1599_v63 = vpop.f32.mrb[16].mxu0 }
0x1112   :  { %v1600_v2 = vadd.f32 %v3280_v24, %v1599_v63  ;;  %v2760_v3 = vpop.f32.mrb[17].mxu0 }
0x1114   :  { %v1603_v4 = vadd.f32 %v1600_v2, %v1450_v57 }
0x1116   :  { %2770 = vmatmul.mubr.msk.f32.vlgmr.msra.gmra.mrb[22].mxu1 %vm79_vm1, %v1603_v4 }
0x1117   :  { %2972 = vmatpush3.bf16.msra.mxu1 %v3240_v11  ;;  %2787 = vmatprep.mubr.msk.f32.mxu1 %vm3119_vm0, %v3120_v1 }
0x1118   :  { %2979 = vmatprep.subr.bf16.mxu1 %v3118_v0 }
0x11e9   :  { %v1673_v6 = vpop.f32.mrb[22].mxu1 }
0x11ea   :  { %v1674_v8 = vadd.f32 %v3291_v29, %v1673_v6  ;;  %v2771_v9 = vpop.f32.mrb[23].mxu1 }
0x11ec   :  { %v1677_v10 = vmax.f32 %v1674_v8, 0.0 }
0x11ee   :  { %v1678_v13 = vadd.f32 %v1677_v10, %v1603_v4 }
0x11f0   :  { %v1679_v14 = vmax.f32 %v1678_v13, 0.0 }
0x11f2   :  { %2781 = vmatmul.mubr.msk.f32.vlgmr.msra.gmra.mrb[18].mxu0 %vm79_vm1, %v1679_v14 }
0x11f3   :  { %2975 = vmatpush3.bf16.msra.mxu0 %v3258_v19  ;;  %2798 = vmatprep.mubr.msk.f32.mxu0 %vm3119_vm0, %v3120_v1 }
0x11f4   :  { %2976 = vmatprep.subr.bf16.mxu0 %v3118_v0 }
0x11f7   :  { %2978 = vmatpush3.bf16.msra.mxu0 %v3273_v23 }
0x11f8   :  { %2985 = vmatprep.subr.bf16.mxu0 %v3118_v0 }
0x12c5   :  { %v1749_v16 = vpop.f32.mrb[18].mxu0 }
0x12c6   :  { %v1750_v17 = vadd.f32 %v3247_v12, %v1749_v16  ;;  %v2782_v18 = vpop.f32.mrb[19].mxu0 }
0x12c8   :  { %v1753_v20 = vsub.f32 %v3255_v15, %v1750_v17 }
0x12ca   :  { %1755 = vrot.lane.b32.xlu0 %v1753_v20, %s3127_s30  ;;  %2788 = vmatmul.mubr.msk.f32.vlgmr.msra.gmra.mrb[24].mxu1 %vm154_vm2, %v1753_v20 }
0x12cb   :  { %2981 = vmatpush3.bf16.msra.mxu1 %v3213_v5  ;;  %2809 = vmatprep.mubr.msk.f32.mxu1 %vm3119_vm0, %v3120_v1 }
0x12cc   :  { %2982 = vmatprep.subr.bf16.mxu1 %v3118_v0 }
0x12cf   :  { %2984 = vmatpush3.bf16.msra.mxu1 %v3219_v7 }
0x12d0   :  { %2988 = vmatprep.subr.bf16.mxu1 %v3118_v0 }
0x133c   :  { %v1756_v21 = vpop.permute.xlu0 %1755 }
0x133d   :  { %1759 = vst.msk [vmem:[#allocation8] sm:$0xff] %vm1758_vm9, %v1756_v21 }
0x139d   :  { %v1828_v22 = vpop.f32.mrb[24].mxu1 }
0x139e   :  { %v1829_v25 = vadd.f32 %v3280_v24, %v1828_v22  ;;  %v2789_v26 = vpop.f32.mrb[25].mxu1 }
0x13a0   :  { %v1832_v27 = vadd.f32 %v1829_v25, %v1679_v14 }
0x13a2   :  { %2799 = vmatmul.mubr.msk.f32.vlgmr.msra.gmra.mrb[20].mxu0 %vm79_vm1, %v1832_v27 }
0x13a3   :  { %2987 = vmatpush3.bf16.msra.mxu0 %v3240_v11  ;;  %2816 = vmatprep.mubr.msk.f32.mxu0 %vm3119_vm0, %v3120_v1 }
0x13a4   :  { %2994 = vmatprep.subr.bf16.mxu0 %v3118_v0 }
0x1475   :  { %v1902_v28 = vpop.f32.mrb[20].mxu0 }
0x1476   :  { %v1903_v30 = vadd.f32 %v3291_v29, %v1902_v28  ;;  %v2800_v31 = vpop.f32.mrb[21].mxu0 }
0x1478   :  { %v1906_v32 = vmax.f32 %v1903_v30, 0.0 }
0x147a   :  { %v1907_v33 = vadd.f32 %v1906_v32, %v1832_v27 }
0x147c   :  { %v1908_v34 = vmax.f32 %v1907_v33, 0.0 }
0x147e   :  { %2810 = vmatmul.mubr.msk.f32.vlgmr.msra.gmra.mrb[26].mxu1 %vm79_vm1, %v1908_v34 }
0x147f   :  { %2990 = vmatpush3.bf16.msra.mxu1 %v3258_v19  ;;  %2827 = vmatprep.mubr.msk.f32.mxu1 %vm3119_vm0, %v3120_v1 }
0x1480   :  { %2991 = vmatprep.subr.bf16.mxu1 %v3118_v0 }
0x1483   :  { %2993 = vmatpush3.bf16.msra.mxu1 %v3273_v23 }
0x1484   :  { %3000 = vmatprep.subr.bf16.mxu1 %v3118_v0 }
0x1551   :  { %v1978_v35 = vpop.f32.mrb[26].mxu1 }
0x1552   :  { %v1979_v36 = vadd.f32 %v3247_v12, %v1978_v35  ;;  %v2811_v37 = vpop.f32.mrb[27].mxu1 }
0x1554   :  { %v1982_v38 = vsub.f32 %v3255_v15, %v1979_v36 }
0x1556   :  { %1983 = vst.msk [vmem:[#allocation8 + $0x8] sm:$0xff] %vm154_vm2, %v1982_v38  ;;  %2817 = vmatmul.mubr.msk.f32.vlgmr.msra.gmra.mrb[22].mxu0 %vm154_vm2, %v1982_v38 }
0x1557   :  { %2996 = vmatpush3.bf16.msra.mxu0 %v3213_v5  ;;  %2838 = vmatprep.mubr.msk.f32.mxu0 %vm3119_vm0, %v3120_v1 }
0x1558   :  { %2997 = vmatprep.subr.bf16.mxu0 %v3118_v0 }
0x155b   :  { %2999 = vmatpush3.bf16.msra.mxu0 %v3219_v7 }
0x155c   :  { %3003 = vmatprep.subr.bf16.mxu0 %v3118_v0 }
0x1629   :  { %v2053_v39 = vpop.f32.mrb[22].mxu0 }
0x162a   :  { %v2054_v40 = vadd.f32 %v3280_v24, %v2053_v39  ;;  %v2818_v41 = vpop.f32.mrb[23].mxu0 }
0x162c   :  { %v2057_v42 = vadd.f32 %v2054_v40, %v1908_v34 }
0x162e   :  { %2828 = vmatmul.mubr.msk.f32.vlgmr.msra.gmra.mrb[28].mxu1 %vm79_vm1, %v2057_v42 }
0x162f   :  { %3002 = vmatpush3.bf16.msra.mxu1 %v3240_v11  ;;  %2845 = vmatprep.mubr.msk.f32.mxu1 %vm3119_vm0, %v3120_v1 }
0x1701   :  { %v2127_v5 = vpop.f32.mrb[28].mxu1 }
0x1702   :  { %v2128_v43 = vadd.f32 %v3291_v29, %v2127_v5  ;;  %v2829_v44 = vpop.f32.mrb[29].mxu1 }
0x1704   :  { %v2131_v45 = vmax.f32 %v2128_v43, 0.0 }
0x1706   :  { %v2132_v7 = vadd.f32 %v2131_v45, %v2057_v42 }
0x1708   :  { %v2133_v46 = vmax.f32 %v2132_v7, 0.0 }
0x170a   :  { %2134 = vst.msk [vmem:[#allocation6] sm:$0xff] %vm79_vm1, %v2133_v46  ;;  %2839 = vmatmul.mubr.msk.f32.vlgmr.msra.gmra.mrb[24].mxu0 %vm79_vm1, %v2133_v46 }
0x170b   :  { %3005 = vmatpush3.bf16.msra.mxu0 %v3258_v19  ;;  %2856 = vmatprep.mubr.msk.f32.mxu0 %vm3119_vm0, %v3120_v1 }
0x170c   :  { %3006 = vmatprep.subr.bf16.mxu0 %v3118_v0 }
0x170f   :  { %3008 = vmatpush3.bf16.msra.mxu0 %v3273_v23 }
0x17dd   :  { %v2204_v11 = vpop.f32.mrb[24].mxu0 }
0x17de   :  { %v2205_v47 = vadd.f32 %v3247_v12, %v2204_v11  ;;  %v2840_v48 = vpop.f32.mrb[25].mxu0 }
0x17e0   :  { %v2208_v49 = vsub.f32 %v3255_v15, %v2205_v47 }
0x17e2   :  { %2210 = vrot.lane.b32.xlu1 %v2208_v49, %s3121_s5  ;;  %2846 = vmatmul.mubr.msk.f32.vlgmr.msra.gmra.mrb[30].mxu1 %vm154_vm2, %v2208_v49 }
0x1854   :  { %v2211_v50 = vpop.permute.xlu1 %2210 }
0x1855   :  { %2213 = vst.msk [vmem:[#allocation8 + $0x8] sm:$0xff] %vm384_vm3, %v2211_v50 }
0x18b5   :  { %v2282_v19 = vpop.f32.mrb[30].mxu1 }
0x18b6   :  { %v2283_v1 = vadd.f32 %v3280_v24, %v2282_v19  ;;  %v2847_v51 = vpop.f32.mrb[31].mxu1 }
0x18b8   :  { %v2286_v0 = vadd.f32 %v2283_v1, %v2133_v46 }
0x18ba   :  { %2857 = vmatmul.mubr.msk.f32.vlgmr.msra.gmra.mrb[26].mxu0 %vm79_vm1, %v2286_v0 }
0x18bb   :  { %3056 = shalt.err (!%p3053_p12)
}
0x18bc   :  { %s3057_s0 = scalar_lea.hbm %s3541_s9, 128 }
0x18bd   :  { %p3058_p13 = scmp.ne.s32.totalorder %s3541_s9, %s3057_s0  ;;  %p3061_p0 = scmp.lt.u32.totalorder %s3057_s0, %s3541_s9 }
0x18bf   :  { %p3063_p1 = pnand %p3061_p0, %p3058_p13 }
0x18c1   :  { %3066 = shalt.err (!%p3063_p1)
}
0x18c2   :  { %2383 = dma.vmem_to_hbm [thread:$0]  %s2381_s12, 128, %s3541_s9, [#allocation7]  }
0x18c3   :  { %s3129_s21 = smov [#allocation8]  }
0x18c4   :  { %s2390_s3 = sshll.u32 %s3129_s21, 4  ;;  %s2391_s3 = int_to_ptr.vmem [resolvable:$true] %s2390_s3 }
0x18c5   :  { %s3067_s4 = scalar_lea.vmem %s2391_s3, 256  ;;  %p3072_p3 = scmp.lt.s32.totalorder %s2391_s3, %s2391_s3 }
0x18c6   :  { %p3068_p2 = scmp.ne.s32.totalorder %s2391_s3, %s3067_s4  ;;  %p3073_p4 = scmp.lt.s32.totalorder %s3067_s4, %s3067_s4 }
0x18c8   :  { %p3074_p5 = por %p3073_p4, %p3072_p3 }
0x18ca   :  { %p3075_p6 = pnand %p3074_p5, %p3068_p2 }
0x18cc   :  { %3078 = shalt.err (!%p3075_p6)
}
0x18cd   :  { %s3079_s24 = scalar_lea.hbm %s3542_s10, 256 }
0x18ce   :  { %p3080_p7 = scmp.ne.s32.totalorder %s3542_s10, %s3079_s24  ;;  %p3083_p8 = scmp.lt.u32.totalorder %s3079_s24, %s3542_s10 }
0x18d0   :  { %p3085_p9 = pnand %p3083_p8, %p3080_p7 }
0x18d2   :  { %3088 = shalt.err (!%p3085_p9)
}
0x18d3   :  { %2393 = dma.vmem_to_hbm [thread:$0]  %s2391_s3, 256, %s3542_s10, [#allocation7]  }
0x18d4   :  { %s3130_s1 = smov [#allocation5]  }
0x18d5   :  { %s2370_s27 = sshll.u32 %s3130_s1, 4  ;;  %s2371_s27 = int_to_ptr.vmem [resolvable:$true] %s2370_s27 }
0x18d6   :  { %s3089_s28 = scalar_lea.vmem %s2371_s27, 128  ;;  %p3094_p11 = scmp.lt.s32.totalorder %s2371_s27, %s2371_s27 }
0x18d7   :  { %p3090_p10 = scmp.ne.s32.totalorder %s2371_s27, %s3089_s28  ;;  %p3095_p12 = scmp.lt.s32.totalorder %s3089_s28, %s3089_s28 }
0x18d9   :  { %p3096_p13 = por %p3095_p12, %p3094_p11 }
0x18db   :  { %p3097_p0 = pnand %p3096_p13, %p3090_p10 }
0x198d   :  { %v2356_v12 = vpop.f32.mrb[26].mxu0 }
0x198e   :  { %v2357_v15 = vadd.f32 %v3291_v29, %v2356_v12  ;;  %v2858_v23 = vpop.f32.mrb[27].mxu0 }
0x1990   :  { %v2360_v24 = vmax.f32 %v2357_v15, 0.0 }
0x1992   :  { %v2361_v52 = vadd.f32 %v2360_v24, %v2286_v0 }
0x1994   :  { %v2362_v53 = vmax.f32 %v2361_v52, 0.0 }
0x1996   :  { %2363 = vst.msk [vmem:[#allocation5] sm:$0xff] %vm79_vm1, %v2362_v53 }
0x1997   :  { %3100 = shalt.err (!%p3097_p0)
}
0x1998   :  { %s3101_s30 = scalar_lea.hbm %s3540_s8, 128 }
0x1999   :  { %p3102_p1 = scmp.ne.s32.totalorder %s3540_s8, %s3101_s30  ;;  %p3105_p2 = scmp.lt.u32.totalorder %s3101_s30, %s3540_s8 }
0x199b   :  { %p3107_p3 = pnand %p3105_p2, %p3102_p1 }
0x199d   :  { %3110 = shalt.err (!%p3107_p3)
}
0x199e   :  { %2373 = dma.vmem_to_hbm [thread:$0]  %s2371_s27, 128, %s3540_s8, [#allocation4]  }
0x199f   :  { %3113 = dma.done.wait [#allocation4], 128  }
0x19a0   :  { %3114 = vsyncadd [#allocation4], 4294967168 }
0x19a1   :  { %3115 = dma.done.wait [#allocation7], 384  }
0x19a2   :  { %3116 = vsyncadd [#allocation7], 4294966912 }
0x19a3   :  { %2403 = vsyncpa [#allocation3], 1 }
0x19a4   :  { %2404 = vsyncpa [#allocation4], 1 }
0x19a5   :  { %2405 = vsyncpa [#allocation7], 1 }

</bundles_post_ra>
